<compile_context>
chip_gen: v7x
topology: tpu7x:2x2x1
jax: 0.10.0
libtpu: 0.0.40
codegen_flags: <defaults>
</compile_context>

<pallas_src>
import functools

import jax
import jax.numpy as jnp
import numpy as np
from jax import lax
from jax.experimental import pallas as pl
from jax.experimental.pallas import tpu as pltpu

EPS = 1e-5
NEG = -1e30      # effective -inf for max-pool padding (finite -> no NaN risk)
LANES = 128      # channel (lane) padding target for lane-dense stores


def _rup(x, m):
    return (x + m - 1) // m * m


# ----------------------------- conv1 (7x7 / s2) ------------------------------

def _conv1_kernel(x_ref, w_ref, b_ref, o_ref):
    # x: [TM, K] bf16 folded im2col,  w: [K, 128] bf16 (BN scale folded),
    # b: [1, 128] f32,  o: [TM, 128] f32
    acc = jnp.dot(x_ref[...], w_ref[...], preferred_element_type=jnp.float32)
    o_ref[...] = jnp.maximum(acc + b_ref[...], 0.0)


def conv1_bn_relu(x_nhwc, w_hwio, scale, bias, *, stride, pad, tile_m=512):
    N, H, W, Cin = x_nhwc.shape
    KH, KW, _, Cout = w_hwio.shape
    Ho = (H + 2 * pad - KH) // stride + 1
    Wo = (W + 2 * pad - KW) // stride + 1

    xp = jnp.pad(x_nhwc, ((0, 0), (pad, pad), (pad, pad), (0, 0)))
    # Folded im2col: taps are concatenated along the channel (contraction) dim
    # BEFORE any padding, so K = 7*7*3 = 147 -> padded to 152 (not 49*8 = 392).
    taps = []
    for kh in range(KH):
        for kw in range(KW):
            taps.append(xp[:, kh:kh + stride * Ho:stride,
                           kw:kw + stride * Wo:stride, :])
    K = KH * KW * Cin
    patches = jnp.concatenate(taps, axis=-1).reshape(N * Ho * Wo, K)

    Kp = _rup(K, 8)
    M = N * Ho * Wo
    TM = tile_m if M >= tile_m else _rup(M, 8)
    Mp = _rup(M, TM)
    lhs = jnp.pad(patches, ((0, Mp - M), (0, Kp - K))).astype(jnp.bfloat16)

    # Fold BN scale into the weights; pad K -> Kp and Cout -> 128 lanes.
    w = (w_hwio * scale[None, None, None, :]).reshape(K, Cout)
    w = jnp.pad(w, ((0, Kp - K), (0, LANES - Cout))).astype(jnp.bfloat16)
    b = jnp.pad(bias, (0, LANES - Cout)).reshape(1, LANES).astype(jnp.float32)

    out = pl.pallas_call(
        _conv1_kernel,
        out_shape=jax.ShapeDtypeStruct((Mp, LANES), jnp.float32),
        grid=(Mp // TM,),
        in_specs=[pl.BlockSpec((TM, Kp), lambda i: (i, 0)),
                  pl.BlockSpec((Kp, LANES), lambda i: (0, 0)),
                  pl.BlockSpec((1, LANES), lambda i: (0, 0))],
        out_specs=pl.BlockSpec((TM, LANES), lambda i: (i, 0)),
        compiler_params=pltpu.CompilerParams(
            dimension_semantics=("parallel",)),
    )(lhs, w, b)
    return out[:M].reshape(N, Ho, Wo, LANES)


# --------------------------- maxpool 3x3 / s2 / p1 ---------------------------

def _pool_kernel(p00_ref, p01_ref, p10_ref, p11_ref, o_ref, *, tile, wq):
    # Each p_ab ref holds one flattened parity grid (whole image, VMEM resident).
    # The nine 3x3/s2 taps are contiguous shifted row slices of the parity grids.
    base = pl.multiple_of(pl.program_id(1) * tile, 8)

    def ld(ref, dh, dw):
        return ref[0, pl.ds(base + dh * wq + dw, tile), :]

    m = ld(p00_ref, 0, 0)
    for ref, dh, dw in ((p00_ref, 0, 1), (p00_ref, 1, 0), (p00_ref, 1, 1),
                        (p01_ref, 0, 0), (p01_ref, 1, 0),
                        (p10_ref, 0, 0), (p10_ref, 0, 1),
                        (p11_ref, 0, 0)):
        m = jnp.maximum(m, ld(ref, dh, dw))
    o_ref[0] = m


def maxpool_3x3_s2_p1(x_nhwc, *, tile_m=512):
    N, H, W, C = x_nhwc.shape
    Ho = (H - 1) // 2 + 1
    Wo = (W - 1) // 2 + 1

    # pad=1 ring with -inf, then pad H/W to even so all parity grids share one width.
    Hp = _rup(H + 2, 2)
    Wp = _rup(W + 2, 2)
    xp = jnp.pad(x_nhwc, ((0, 0), (1, Hp - H - 1), (1, Wp - W - 1), (0, 0)),
                 constant_values=NEG)
    hq, wq = Hp // 2, Wp // 2

    M = Ho * wq                       # output computed over (Ho, wq); cols >= Wo dropped
    TM = tile_m if M >= tile_m else _rup(M, 8)
    Mp = _rup(M, TM)
    Rreq = _rup(Mp + wq + 2, 8)       # rows each flattened parity grid must provide

    parts = []
    for a in range(2):
        for b in range(2):
            p = xp[:, a::2, b::2, :].reshape(N, hq * wq, C)
            p = jnp.pad(p, ((0, 0), (0, Rreq - hq * wq), (0, 0)),
                        constant_values=NEG)
            parts.append(p)

    out = pl.pallas_call(
        functools.partial(_pool_kernel, tile=TM, wq=wq),
        out_shape=jax.ShapeDtypeStruct((N, Mp, C), jnp.float32),
        grid=(N, Mp // TM),
        in_specs=[pl.BlockSpec((1, Rreq, C), lambda n, i: (n, 0, 0))] * 4,
        out_specs=pl.BlockSpec((1, TM, C), lambda n, i: (n, i, 0)),
        compiler_params=pltpu.CompilerParams(
            dimension_semantics=("parallel", "parallel")),
    )(*parts)
    return out[:, :Ho * wq, :].reshape(N, Ho, wq, C)[:, :, :Wo, :]


# ----------------------------- conv2 (3x3 / s1) ------------------------------

def _conv2_kernel(x_ref, w_ref, b_ref, o_ref, *, tile, wq, kh_kw):
    # x: [1, Rin, Cin] f32 whole flattened (zero-padded) image, VMEM resident.
    # w: [taps, Cin, 128] bf16 (BN scale folded), b: [1, 128] f32.
    base = pl.multiple_of(pl.program_id(1) * tile, 8)
    acc = jnp.zeros((tile, o_ref.shape[-1]), jnp.float32)
    for t, (kh, kw) in enumerate(kh_kw):
        xs = x_ref[0, pl.ds(base + kh * wq + kw, tile), :].astype(jnp.bfloat16)
        acc = acc + jnp.dot(xs, w_ref[t], preferred_element_type=jnp.float32)
    o_ref[0] = jnp.maximum(acc + b_ref[...], 0.0)


def conv2_bn_relu(x_nhwc, w_hwio, scale, bias, *, pad=1, tile_m=256):
    N, H, W, Cin = x_nhwc.shape
    KH, KW, Cin_w, Cout = w_hwio.shape
    assert Cin >= Cin_w
    Ho, Wo = H, W                      # stride 1, same padding
    Wq = W + 2 * pad                   # compute over padded width; garbage cols dropped

    xp = jnp.pad(x_nhwc, ((0, 0), (pad, pad), (pad, pad), (0, 0)))
    R = (H + 2 * pad) * Wq
    M = Ho * Wq
    TM = tile_m if M >= tile_m else _rup(M, 8)
    Mp = _rup(M, TM)
    max_off = (KH - 1) * Wq + (KW - 1)
    Rin = _rup(max(R, Mp + max_off + 1), 8)
    xf = jnp.pad(xp.reshape(N, R, Cin), ((0, 0), (0, Rin - R), (0, 0)))

    w = w_hwio * scale[None, None, None, :]
    w = jnp.pad(w, ((0, 0), (0, 0), (0, Cin - Cin_w), (0, LANES - Cout)))
    w = w.reshape(KH * KW, Cin, LANES).astype(jnp.bfloat16)
    b = jnp.pad(bias, (0, LANES - Cout)).reshape(1, LANES).astype(jnp.float32)

    kh_kw = tuple((kh, kw) for kh in range(KH) for kw in range(KW))
    out = pl.pallas_call(
        functools.partial(_conv2_kernel, tile=TM, wq=Wq, kh_kw=kh_kw),
        out_shape=jax.ShapeDtypeStruct((N, Mp, LANES), jnp.float32),
        grid=(N, Mp // TM),
        in_specs=[pl.BlockSpec((1, Rin, Cin), lambda n, i: (n, 0, 0)),
                  pl.BlockSpec((KH * KW, Cin, LANES), lambda n, i: (0, 0, 0)),
                  pl.BlockSpec((1, LANES), lambda n, i: (0, 0))],
        out_specs=pl.BlockSpec((1, TM, LANES), lambda n, i: (n, i, 0)),
        compiler_params=pltpu.CompilerParams(
            dimension_semantics=("parallel", "parallel")),
    )(xf, w, b)
    return out[:, :M, :].reshape(N, Ho, Wq, LANES)[:, :, :Wo, :]


# ------------------------------ full forward ---------------------------------

def cornet_v1_block(x_nchw, p):
    """Forward pass of CORnet_V1_Block (fake_relu=False path)."""
    # TODO(synk): fake_relu=True (FakeReLU.apply) only changes the backward pass;
    # the forward is identical to ReLU, so it is not modeled here.
    x = jnp.transpose(x_nchw, (0, 2, 3, 1)).astype(jnp.float32)      # NCHW -> NHWC

    s1 = p["bn1_gamma"] * lax.rsqrt(p["bn1_var"] + EPS)
    b1 = p["bn1_beta"] - p["bn1_mean"] * s1
    s2 = p["bn2_gamma"] * lax.rsqrt(p["bn2_var"] + EPS)
    b2 = p["bn2_beta"] - p["bn2_mean"] * s2

    y = conv1_bn_relu(x, p["w1"], s1, b1, stride=2, pad=3)           # [N,H1,W1,128]
    y = maxpool_3x3_s2_p1(y)                                         # [N,H2,W2,128]
    y = conv2_bn_relu(y, p["w2"], s2, b2, pad=1)                     # [N,H2,W2,128]
    y = y[..., :p["w2"].shape[-1]]                                   # drop padded channels
    return jnp.transpose(y, (0, 3, 1, 2))                            # NHWC -> NCHW


# ------------------------------- reference -----------------------------------

def reference(x_nchw, p):
    x = jnp.transpose(x_nchw, (0, 2, 3, 1)).astype(jnp.float32)
    y = lax.conv_general_dilated(x, p["w1"], (2, 2), [(3, 3), (3, 3)],
                                 dimension_numbers=("NHWC", "HWIO", "NHWC"))
    y = (y - p["bn1_mean"]) * lax.rsqrt(p["bn1_var"] + EPS) * p["bn1_gamma"] + p["bn1_beta"]
    y = jnp.maximum(y, 0.0)
    y = lax.reduce_window(y, -jnp.inf, lax.max, (1, 3, 3, 1), (1, 2, 2, 1),
                          ((0, 0), (1, 1), (1, 1), (0, 0)))
    y = lax.conv_general_dilated(y, p["w2"], (1, 1), [(1, 1), (1, 1)],
                                 dimension_numbers=("NHWC", "HWIO", "NHWC"))
    y = (y - p["bn2_mean"]) * lax.rsqrt(p["bn2_var"] + EPS) * p["bn2_gamma"] + p["bn2_beta"]
    y = jnp.maximum(y, 0.0)
    return jnp.transpose(y, (0, 3, 1, 2))


# --------------------------------- main ---------------------------------------

if __name__ == "__main__":
    key = jax.random.PRNGKey(0)
    ks = jax.random.split(key, 11)

    params = {
        # weights stored as HWIO (kh, kw, cin, cout)
        "w1": 0.1 * jax.random.normal(ks[0], (7, 7, 3, 64), jnp.float32),
        "w2": 0.05 * jax.random.normal(ks[1], (3, 3, 64, 64), jnp.float32),
        "bn1_gamma": 1.0 + 0.1 * jax.random.normal(ks[2], (64,), jnp.float32),
        "bn1_beta": 0.1 * jax.random.normal(ks[3], (64,), jnp.float32),
        "bn1_mean": 0.05 * jax.random.normal(ks[4], (64,), jnp.float32),
        "bn1_var": jax.random.uniform(ks[5], (64,), jnp.float32, 0.5, 1.5),
        "bn2_gamma": 1.0 + 0.1 * jax.random.normal(ks[6], (64,), jnp.float32),
        "bn2_beta": 0.1 * jax.random.normal(ks[7], (64,), jnp.float32),
        "bn2_mean": 0.05 * jax.random.normal(ks[8], (64,), jnp.float32),
        "bn2_var": jax.random.uniform(ks[9], (64,), jnp.float32, 0.5, 1.5),
    }

    # small input consistent with the module: N=2, C=3 (conv1 expects 3), H=W=16
    x = jax.random.normal(ks[10], (2, 3, 16, 16), jnp.float32)

    fwd = jax.jit(cornet_v1_block)
    out = jax.block_until_ready(fwd(x, params))
    assert out.shape == (2, 64, 4, 4), out.shape

    ref = jax.block_until_ready(reference(x, params))
    np.testing.assert_allclose(np.asarray(out), np.asarray(ref), rtol=5e-2, atol=5e-2)

    print("KERNEL_OK")
</pallas_src>

<mosaic_0001>
module attributes {stable_mosaic.version = 11 : i64} {
  func.func @_conv1_kernel(%arg0: i32, %arg1: memref<128x152xbf16, #tpu.memory_space<vmem>>, %arg2: memref<152x128xbf16, #tpu.memory_space<vmem>>, %arg3: memref<1x128xf32, #tpu.memory_space<vmem>>, %arg4: memref<128x128xf32, #tpu.memory_space<vmem>>) attributes {dimension_semantics = [#tpu.dimension_semantics<parallel>], iteration_bounds = array<i64: 1>, scalar_prefetch = 0 : i64, scratch_operands = 0 : i64, tpu.core_type = #tpu.core_type<tc>, window_params = [{transform_indices = @transform_0, window_bounds = array<i64: 128, 152>}, {pipeline_mode = #tpu.pipeline_mode<synchronous>, transform_indices = @transform_1, window_bounds = array<i64: 152, 128>}, {pipeline_mode = #tpu.pipeline_mode<synchronous>, transform_indices = @transform_2, window_bounds = array<i64: 1, 128>}, {transform_indices = @transform_3, window_bounds = array<i64: 128, 128>}]} {
    %c0 = arith.constant 0 : index
    %c0_0 = arith.constant 0 : index
    %0 = vector.load %arg1[%c0, %c0_0] : memref<128x152xbf16, #tpu.memory_space<vmem>>, vector<128x152xbf16>
    %c0_1 = arith.constant 0 : index
    %c0_2 = arith.constant 0 : index
    %1 = vector.load %arg2[%c0_1, %c0_2] : memref<152x128xbf16, #tpu.memory_space<vmem>>, vector<152x128xbf16>
    %cst = arith.constant dense<0.000000e+00> : vector<128x128xf32>
    %2 = tpu.matmul %0, %1, %cst {dimension_numbers = #tpu.dot_dimension_numbers<[1], [0], [0], [1], [0, 0, 1, 1], [], []>} : vector<128x152xbf16>, vector<152x128xbf16>, vector<128x128xf32> -> vector<128x128xf32>
    %c0_3 = arith.constant 0 : index
    %c0_4 = arith.constant 0 : index
    %3 = vector.load %arg3[%c0_3, %c0_4] : memref<1x128xf32, #tpu.memory_space<vmem>>, vector<1x128xf32>
    %4 = vector.broadcast %3 : vector<1x128xf32> to vector<128x128xf32>
    %5 = arith.addf %2, %4 : vector<128x128xf32>
    %cst_5 = arith.constant 0.000000e+00 : f32
    %6 = vector.broadcast %cst_5 : f32 to vector<128x128xf32>
    %7 = arith.maximumf %5, %6 : vector<128x128xf32>
    %c0_6 = arith.constant 0 : index
    %c0_7 = arith.constant 0 : index
    %8 = vector.load %arg4[%c0_6, %c0_7] : memref<128x128xf32, #tpu.memory_space<vmem>>, vector<128x128xf32>
    tpu.vector_store %arg4[%c0_6, %c0_7], %7 {strides = array<i32>} : memref<128x128xf32, #tpu.memory_space<vmem>>, vector<128x128xf32>,
    return
  }
  func.func @transform_0(%arg0: i32) -> (i32, i32) {
    %c0_i32 = arith.constant 0 : i32
    %c0_i32_0 = arith.constant 0 : i32
    return %arg0, %c0_i32 : i32, i32
  }
  func.func @transform_1(%arg0: i32) -> (i32, i32) {
    %c0_i32 = arith.constant 0 : i32
    %c0_i32_0 = arith.constant 0 : i32
    %c0_i32_1 = arith.constant 0 : i32
    return %c0_i32, %c0_i32_0 : i32, i32
  }
  func.func @transform_2(%arg0: i32) -> (i32, i32) {
    %c0_i32 = arith.constant 0 : i32
    %c0_i32_0 = arith.constant 0 : i32
    %c0_i32_1 = arith.constant 0 : i32
    return %c0_i32, %c0_i32_0 : i32, i32
  }
  func.func @transform_3(%arg0: i32) -> (i32, i32) {
    %c0_i32 = arith.constant 0 : i32
    %c0_i32_0 = arith.constant 0 : i32
    return %arg0, %c0_i32 : i32, i32
  }
}

module attributes {stable_mosaic.version = 11 : i64} {
  func.func @_pool_kernel(%arg0: i32, %arg1: i32, %arg2: memref<1x32x128xf32, #tpu.memory_space<vmem>>, %arg3: memref<1x32x128xf32, #tpu.memory_space<vmem>>, %arg4: memref<1x32x128xf32, #tpu.memory_space<vmem>>, %arg5: memref<1x32x128xf32, #tpu.memory_space<vmem>>, %arg6: memref<1x24x128xf32, #tpu.memory_space<vmem>>) attributes {dimension_semantics = [#tpu.dimension_semantics<parallel>, #tpu.dimension_semantics<parallel>], iteration_bounds = array<i64: 2, 1>, scalar_prefetch = 0 : i64, scratch_operands = 0 : i64, tpu.core_type = #tpu.core_type<tc>, window_params = [{transform_indices = @transform_0, window_bounds = array<i64: 1, 32, 128>}, {transform_indices = @transform_1, window_bounds = array<i64: 1, 32, 128>}, {transform_indices = @transform_2, window_bounds = array<i64: 1, 32, 128>}, {transform_indices = @transform_3, window_bounds = array<i64: 1, 32, 128>}, {transform_indices = @transform_4, window_bounds = array<i64: 1, 24, 128>}]} {
    %c24_i32 = arith.constant 24 : i32
    %0 = arith.muli %arg1, %c24_i32 : i32
    %1 = tpu.assume_multiple %0, 8 : i32
    %c0_i32 = arith.constant 0 : i32
    %2 = arith.addi %1, %c0_i32 : i32
    %c0_i32_0 = arith.constant 0 : i32
    %3 = arith.addi %2, %c0_i32_0 : i32
    %c0 = arith.constant 0 : index
    %4 = arith.index_cast %3 : i32 to index
    %c0_1 = arith.constant 0 : index
    %5 = vector.load %arg2[%c0, %4, %c0_1] : memref<1x32x128xf32, #tpu.memory_space<vmem>>, vector<1x24x128xf32>
    %6 = vector.shape_cast %5 : vector<1x24x128xf32> to vector<24x128xf32>
    %c0_i32_2 = arith.constant 0 : i32
    %7 = arith.addi %1, %c0_i32_2 : i32
    %c1_i32 = arith.constant 1 : i32
    %8 = arith.addi %7, %c1_i32 : i32
    %c0_3 = arith.constant 0 : index
    %9 = arith.index_cast %8 : i32 to index
    %c0_4 = arith.constant 0 : index
    %10 = vector.load %arg2[%c0_3, %9, %c0_4] : memref<1x32x128xf32, #tpu.memory_space<vmem>>, vector<1x24x128xf32>
    %11 = vector.shape_cast %10 : vector<1x24x128xf32> to vector<24x128xf32>
    %12 = arith.maximumf %6, %11 : vector<24x128xf32>
    %c5_i32 = arith.constant 5 : i32
    %13 = arith.addi %1, %c5_i32 : i32
    %c0_i32_5 = arith.constant 0 : i32
    %14 = arith.addi %13, %c0_i32_5 : i32
    %c0_6 = arith.constant 0 : index
    %15 = arith.index_cast %14 : i32 to index
    %c0_7 = arith.constant 0 : index
    %16 = vector.load %arg2[%c0_6, %15, %c0_7] : memref<1x32x128xf32, #tpu.memory_space<vmem>>, vector<1x24x128xf32>
    %17 = vector.shape_cast %16 : vector<1x24x128xf32> to vector<24x128xf32>
    %18 = arith.maximumf %12, %17 : vector<24x128xf32>
    %c5_i32_8 = arith.constant 5 : i32
    %19 = arith.addi %1, %c5_i32_8 : i32
    %c1_i32_9 = arith.constant 1 : i32
    %20 = arith.addi %19, %c1_i32_9 : i32
    %c0_10 = arith.constant 0 : index
    %21 = arith.index_cast %20 : i32 to index
    %c0_11 = arith.constant 0 : index
    %22 = vector.load %arg2[%c0_10, %21, %c0_11] : memref<1x32x128xf32, #tpu.memory_space<vmem>>, vector<1x24x128xf32>
    %23 = vector.shape_cast %22 : vector<1x24x128xf32> to vector<24x128xf32>
    %24 = arith.maximumf %18, %23 : vector<24x128xf32>
    %c0_i32_12 = arith.constant 0 : i32
    %25 = arith.addi %1, %c0_i32_12 : i32
    %c0_i32_13 = arith.constant 0 : i32
    %26 = arith.addi %25, %c0_i32_13 : i32
    %c0_14 = arith.constant 0 : index
    %27 = arith.index_cast %26 : i32 to index
    %c0_15 = arith.constant 0 : index
    %28 = vector.load %arg3[%c0_14, %27, %c0_15] : memref<1x32x128xf32, #tpu.memory_space<vmem>>, vector<1x24x128xf32>
    %29 = vector.shape_cast %28 : vector<1x24x128xf32> to vector<24x128xf32>
    %30 = arith.maximumf %24, %29 : vector<24x128xf32>
    %c5_i32_16 = arith.constant 5 : i32
    %31 = arith.addi %1, %c5_i32_16 : i32
    %c0_i32_17 = arith.constant 0 : i32
    %32 = arith.addi %31, %c0_i32_17 : i32
    %c0_18 = arith.constant 0 : index
    %33 = arith.index_cast %32 : i32 to index
    %c0_19 = arith.constant 0 : index
    %34 = vector.load %arg3[%c0_18, %33, %c0_19] : memref<1x32x128xf32, #tpu.memory_space<vmem>>, vector<1x24x128xf32>
    %35 = vector.shape_cast %34 : vector<1x24x128xf32> to vector<24x128xf32>
    %36 = arith.maximumf %30, %35 : vector<24x128xf32>
    %c0_i32_20 = arith.constant 0 : i32
    %37 = arith.addi %1, %c0_i32_20 : i32
    %c0_i32_21 = arith.constant 0 : i32
    %38 = arith.addi %37, %c0_i32_21 : i32
    %c0_22 = arith.constant 0 : index
    %39 = arith.index_cast %38 : i32 to index
    %c0_23 = arith.constant 0 : index
    %40 = vector.load %arg4[%c0_22, %39, %c0_23] : memref<1x32x128xf32, #tpu.memory_space<vmem>>, vector<1x24x128xf32>
    %41 = vector.shape_cast %40 : vector<1x24x128xf32> to vector<24x128xf32>
    %42 = arith.maximumf %36, %41 : vector<24x128xf32>
    %c0_i32_24 = arith.constant 0 : i32
    %43 = arith.addi %1, %c0_i32_24 : i32
    %c1_i32_25 = arith.constant 1 : i32
    %44 = arith.addi %43, %c1_i32_25 : i32
    %c0_26 = arith.constant 0 : index
    %45 = arith.index_cast %44 : i32 to index
    %c0_27 = arith.constant 0 : index
    %46 = vector.load %arg4[%c0_26, %45, %c0_27] : memref<1x32x128xf32, #tpu.memory_space<vmem>>, vector<1x24x128xf32>
    %47 = vector.shape_cast %46 : vector<1x24x128xf32> to vector<24x128xf32>
    %48 = arith.maximumf %42, %47 : vector<24x128xf32>
    %c0_i32_28 = arith.constant 0 : i32
    %49 = arith.addi %1, %c0_i32_28 : i32
    %c0_i32_29 = arith.constant 0 : i32
    %50 = arith.addi %49, %c0_i32_29 : i32
    %c0_30 = arith.constant 0 : index
    %51 = arith.index_cast %50 : i32 to index
    %c0_31 = arith.constant 0 : index
    %52 = vector.load %arg5[%c0_30, %51, %c0_31] : memref<1x32x128xf32, #tpu.memory_space<vmem>>, vector<1x24x128xf32>
    %53 = vector.shape_cast %52 : vector<1x24x128xf32> to vector<24x128xf32>
    %54 = arith.maximumf %48, %53 : vector<24x128xf32>
    %c0_32 = arith.constant 0 : index
    %c0_33 = arith.constant 0 : index
    %c0_34 = arith.constant 0 : index
    %55 = vector.load %arg6[%c0_32, %c0_33, %c0_34] : memref<1x24x128xf32, #tpu.memory_space<vmem>>, vector<1x24x128xf32>
    %56 = vector.shape_cast %55 : vector<1x24x128xf32> to vector<24x128xf32>
    %57 = vector.shape_cast %54 : vector<24x128xf32> to vector<1x24x128xf32>
    tpu.vector_store %arg6[%c0_32, %c0_33, %c0_34], %57 {strides = array<i32>} : memref<1x24x128xf32, #tpu.memory_space<vmem>>, vector<1x24x128xf32>,
    return
  }
  func.func @transform_0(%arg0: i32, %arg1: i32) -> (i32, i32, i32) {
    %c0_i32 = arith.constant 0 : i32
    %c0_i32_0 = arith.constant 0 : i32
    %c0_i32_1 = arith.constant 0 : i32
    return %arg0, %c0_i32, %c0_i32_0 : i32, i32, i32
  }
  func.func @transform_1(%arg0: i32, %arg1: i32) -> (i32, i32, i32) {
    %c0_i32 = arith.constant 0 : i32
    %c0_i32_0 = arith.constant 0 : i32
    %c0_i32_1 = arith.constant 0 : i32
    return %arg0, %c0_i32, %c0_i32_0 : i32, i32, i32
  }
  func.func @transform_2(%arg0: i32, %arg1: i32) -> (i32, i32, i32) {
    %c0_i32 = arith.constant 0 : i32
    %c0_i32_0 = arith.constant 0 : i32
    %c0_i32_1 = arith.constant 0 : i32
    return %arg0, %c0_i32, %c0_i32_0 : i32, i32, i32
  }
  func.func @transform_3(%arg0: i32, %arg1: i32) -> (i32, i32, i32) {
    %c0_i32 = arith.constant 0 : i32
    %c0_i32_0 = arith.constant 0 : i32
    %c0_i32_1 = arith.constant 0 : i32
    return %arg0, %c0_i32, %c0_i32_0 : i32, i32, i32
  }
  func.func @transform_4(%arg0: i32, %arg1: i32) -> (i32, i32, i32) {
    %c0_i32 = arith.constant 0 : i32
    %c0_i32_0 = arith.constant 0 : i32
    return %arg0, %arg1, %c0_i32 : i32, i32, i32
  }
}

module attributes {stable_mosaic.version = 11 : i64} {
  func.func @_conv2_kernel(%arg0: i32, %arg1: i32, %arg2: memref<1x40x128xf32, #tpu.memory_space<vmem>>, %arg3: memref<9x128x128xbf16, #tpu.memory_space<vmem>>, %arg4: memref<1x128xf32, #tpu.memory_space<vmem>>, %arg5: memref<1x24x128xf32, #tpu.memory_space<vmem>>) attributes {dimension_semantics = [#tpu.dimension_semantics<parallel>, #tpu.dimension_semantics<parallel>], iteration_bounds = array<i64: 2, 1>, scalar_prefetch = 0 : i64, scratch_operands = 0 : i64, tpu.core_type = #tpu.core_type<tc>, window_params = [{transform_indices = @transform_0, window_bounds = array<i64: 1, 40, 128>}, {pipeline_mode = #tpu.pipeline_mode<synchronous>, transform_indices = @transform_1, window_bounds = array<i64: 9, 128, 128>}, {pipeline_mode = #tpu.pipeline_mode<synchronous>, transform_indices = @transform_2, window_bounds = array<i64: 1, 128>}, {transform_indices = @transform_3, window_bounds = array<i64: 1, 24, 128>}]} {
    %c24_i32 = arith.constant 24 : i32
    %0 = arith.muli %arg1, %c24_i32 : i32
    %1 = tpu.assume_multiple %0, 8 : i32
    %cst = arith.constant 0.000000e+00 : f32
    %2 = vector.broadcast %cst : f32 to vector<24x128xf32>
    %c0_i32 = arith.constant 0 : i32
    %3 = arith.addi %1, %c0_i32 : i32
    %c0_i32_0 = arith.constant 0 : i32
    %4 = arith.addi %3, %c0_i32_0 : i32
    %c0 = arith.constant 0 : index
    %5 = arith.index_cast %4 : i32 to index
    %c0_1 = arith.constant 0 : index
    %6 = vector.load %arg2[%c0, %5, %c0_1] : memref<1x40x128xf32, #tpu.memory_space<vmem>>, vector<1x24x128xf32>
    %7 = vector.shape_cast %6 : vector<1x24x128xf32> to vector<24x128xf32>
    %8 = arith.truncf %7 : vector<24x128xf32> to vector<24x128xbf16>
    %c0_2 = arith.constant 0 : index
    %c0_3 = arith.constant 0 : index
    %c0_4 = arith.constant 0 : index
    %9 = vector.load %arg3[%c0_2, %c0_3, %c0_4] : memref<9x128x128xbf16, #tpu.memory_space<vmem>>, vector<1x128x128xbf16>
    %10 = vector.shape_cast %9 : vector<1x128x128xbf16> to vector<128x128xbf16>
    %cst_5 = arith.constant dense<0.000000e+00> : vector<24x128xf32>
    %11 = tpu.matmul %8, %10, %cst_5 {dimension_numbers = #tpu.dot_dimension_numbers<[1], [0], [0], [1], [0, 0, 1, 1], [], []>} : vector<24x128xbf16>, vector<128x128xbf16>, vector<24x128xf32> -> vector<24x128xf32>
    %12 = arith.addf %2, %11 : vector<24x128xf32>
    %c0_i32_6 = arith.constant 0 : i32
    %13 = arith.addi %1, %c0_i32_6 : i32
    %c1_i32 = arith.constant 1 : i32
    %14 = arith.addi %13, %c1_i32 : i32
    %c0_7 = arith.constant 0 : index
    %15 = arith.index_cast %14 : i32 to index
    %c0_8 = arith.constant 0 : index
    %16 = vector.load %arg2[%c0_7, %15, %c0_8] : memref<1x40x128xf32, #tpu.memory_space<vmem>>, vector<1x24x128xf32>
    %17 = vector.shape_cast %16 : vector<1x24x128xf32> to vector<24x128xf32>
    %18 = arith.truncf %17 : vector<24x128xf32> to vector<24x128xbf16>
    %c1 = arith.constant 1 : index
    %c0_9 = arith.constant 0 : index
    %c0_10 = arith.constant 0 : index
    %19 = vector.load %arg3[%c1, %c0_9, %c0_10] : memref<9x128x128xbf16, #tpu.memory_space<vmem>>, vector<1x128x128xbf16>
    %20 = vector.shape_cast %19 : vector<1x128x128xbf16> to vector<128x128xbf16>
    %cst_11 = arith.constant dense<0.000000e+00> : vector<24x128xf32>
    %21 = tpu.matmul %18, %20, %cst_11 {dimension_numbers = #tpu.dot_dimension_numbers<[1], [0], [0], [1], [0, 0, 1, 1], [], []>} : vector<24x128xbf16>, vector<128x128xbf16>, vector<24x128xf32> -> vector<24x128xf32>
    %22 = arith.addf %12, %21 : vector<24x128xf32>
    %c0_i32_12 = arith.constant 0 : i32
    %23 = arith.addi %1, %c0_i32_12 : i32
    %c2_i32 = arith.constant 2 : i32
    %24 = arith.addi %23, %c2_i32 : i32
    %c0_13 = arith.constant 0 : index
    %25 = arith.index_cast %24 : i32 to index
    %c0_14 = arith.constant 0 : index
    %26 = vector.load %arg2[%c0_13, %25, %c0_14] : memref<1x40x128xf32, #tpu.memory_space<vmem>>, vector<1x24x128xf32>
    %27 = vector.shape_cast %26 : vector<1x24x128xf32> to vector<24x128xf32>
    %28 = arith.truncf %27 : vector<24x128xf32> to vector<24x128xbf16>
    %c2 = arith.constant 2 : index
    %c0_15 = arith.constant 0 : index
    %c0_16 = arith.constant 0 : index
    %29 = vector.load %arg3[%c2, %c0_15, %c0_16] : memref<9x128x128xbf16, #tpu.memory_space<vmem>>, vector<1x128x128xbf16>
    %30 = vector.shape_cast %29 : vector<1x128x128xbf16> to vector<128x128xbf16>
    %cst_17 = arith.constant dense<0.000000e+00> : vector<24x128xf32>
    %31 = tpu.matmul %28, %30, %cst_17 {dimension_numbers = #tpu.dot_dimension_numbers<[1], [0], [0], [1], [0, 0, 1, 1], [], []>} : vector<24x128xbf16>, vector<128x128xbf16>, vector<24x128xf32> -> vector<24x128xf32>
    %32 = arith.addf %22, %31 : vector<24x128xf32>
    %c6_i32 = arith.constant 6 : i32
    %33 = arith.addi %1, %c6_i32 : i32
    %c0_i32_18 = arith.constant 0 : i32
    %34 = arith.addi %33, %c0_i32_18 : i32
    %c0_19 = arith.constant 0 : index
    %35 = arith.index_cast %34 : i32 to index
    %c0_20 = arith.constant 0 : index
    %36 = vector.load %arg2[%c0_19, %35, %c0_20] : memref<1x40x128xf32, #tpu.memory_space<vmem>>, vector<1x24x128xf32>
    %37 = vector.shape_cast %36 : vector<1x24x128xf32> to vector<24x128xf32>
    %38 = arith.truncf %37 : vector<24x128xf32> to vector<24x128xbf16>
    %c3 = arith.constant 3 : index
    %c0_21 = arith.constant 0 : index
    %c0_22 = arith.constant 0 : index
    %39 = vector.load %arg3[%c3, %c0_21, %c0_22] : memref<9x128x128xbf16, #tpu.memory_space<vmem>>, vector<1x128x128xbf16>
    %40 = vector.shape_cast %39 : vector<1x128x128xbf16> to vector<128x128xbf16>
    %cst_23 = arith.constant dense<0.000000e+00> : vector<24x128xf32>
    %41 = tpu.matmul %38, %40, %cst_23 {dimension_numbers = #tpu.dot_dimension_numbers<[1], [0], [0], [1], [0, 0, 1, 1], [], []>} : vector<24x128xbf16>, vector<128x128xbf16>, vector<24x128xf32> -> vector<24x128xf32>
    %42 = arith.addf %32, %41 : vector<24x128xf32>
    %c6_i32_24 = arith.constant 6 : i32
    %43 = arith.addi %1, %c6_i32_24 : i32
    %c1_i32_25 = arith.constant 1 : i32
    %44 = arith.addi %43, %c1_i32_25 : i32
    %c0_26 = arith.constant 0 : index
    %45 = arith.index_cast %44 : i32 to index
    %c0_27 = arith.constant 0 : index
    %46 = vector.load %arg2[%c0_26, %45, %c0_27] : memref<1x40x128xf32, #tpu.memory_space<vmem>>, vector<1x24x128xf32>
    %47 = vector.shape_cast %46 : vector<1x24x128xf32> to vector<24x128xf32>
    %48 = arith.truncf %47 : vector<24x128xf32> to vector<24x128xbf16>
    %c4 = arith.constant 4 : index
    %c0_28 = arith.constant 0 : index
    %c0_29 = arith.constant 0 : index
    %49 = vector.load %arg3[%c4, %c0_28, %c0_29] : memref<9x128x128xbf16, #tpu.memory_space<vmem>>, vector<1x128x128xbf16>
    %50 = vector.shape_cast %49 : vector<1x128x128xbf16> to vector<128x128xbf16>
    %cst_30 = arith.constant dense<0.000000e+00> : vector<24x128xf32>
    %51 = tpu.matmul %48, %50, %cst_30 {dimension_numbers = #tpu.dot_dimension_numbers<[1], [0], [0], [1], [0, 0, 1, 1], [], []>} : vector<24x128xbf16>, vector<128x128xbf16>, vector<24x128xf32> -> vector<24x128xf32>
    %52 = arith.addf %42, %51 : vector<24x128xf32>
    %c6_i32_31 = arith.constant 6 : i32
    %53 = arith.addi %1, %c6_i32_31 : i32
    %c2_i32_32 = arith.constant 2 : i32
    %54 = arith.addi %53, %c2_i32_32 : i32
    %c0_33 = arith.constant 0 : index
    %55 = arith.index_cast %54 : i32 to index
    %c0_34 = arith.constant 0 : index
    %56 = vector.load %arg2[%c0_33, %55, %c0_34] : memref<1x40x128xf32, #tpu.memory_space<vmem>>, vector<1x24x128xf32>
    %57 = vector.shape_cast %56 : vector<1x24x128xf32> to vector<24x128xf32>
    %58 = arith.truncf %57 : vector<24x128xf32> to vector<24x128xbf16>
    %c5 = arith.constant 5 : index
    %c0_35 = arith.constant 0 : index
    %c0_36 = arith.constant 0 : index
    %59 = vector.load %arg3[%c5, %c0_35, %c0_36] : memref<9x128x128xbf16, #tpu.memory_space<vmem>>, vector<1x128x128xbf16>
    %60 = vector.shape_cast %59 : vector<1x128x128xbf16> to vector<128x128xbf16>
    %cst_37 = arith.constant dense<0.000000e+00> : vector<24x128xf32>
    %61 = tpu.matmul %58, %60, %cst_37 {dimension_numbers = #tpu.dot_dimension_numbers<[1], [0], [0], [1], [0, 0, 1, 1], [], []>} : vector<24x128xbf16>, vector<128x128xbf16>, vector<24x128xf32> -> vector<24x128xf32>
    %62 = arith.addf %52, %61 : vector<24x128xf32>
    %c12_i32 = arith.constant 12 : i32
    %63 = arith.addi %1, %c12_i32 : i32
    %c0_i32_38 = arith.constant 0 : i32
    %64 = arith.addi %63, %c0_i32_38 : i32
    %c0_39 = arith.constant 0 : index
    %65 = arith.index_cast %64 : i32 to index
    %c0_40 = arith.constant 0 : index
    %66 = vector.load %arg2[%c0_39, %65, %c0_40] : memref<1x40x128xf32, #tpu.memory_space<vmem>>, vector<1x24x128xf32>
    %67 = vector.shape_cast %66 : vector<1x24x128xf32> to vector<24x128xf32>
    %68 = arith.truncf %67 : vector<24x128xf32> to vector<24x128xbf16>
    %c6 = arith.constant 6 : index
    %c0_41 = arith.constant 0 : index
    %c0_42 = arith.constant 0 : index
    %69 = vector.load %arg3[%c6, %c0_41, %c0_42] : memref<9x128x128xbf16, #tpu.memory_space<vmem>>, vector<1x128x128xbf16>
    %70 = vector.shape_cast %69 : vector<1x128x128xbf16> to vector<128x128xbf16>
    %cst_43 = arith.constant dense<0.000000e+00> : vector<24x128xf32>
    %71 = tpu.matmul %68, %70, %cst_43 {dimension_numbers = #tpu.dot_dimension_numbers<[1], [0], [0], [1], [0, 0, 1, 1], [], []>} : vector<24x128xbf16>, vector<128x128xbf16>, vector<24x128xf32> -> vector<24x128xf32>
    %72 = arith.addf %62, %71 : vector<24x128xf32>
    %c12_i32_44 = arith.constant 12 : i32
    %73 = arith.addi %1, %c12_i32_44 : i32
    %c1_i32_45 = arith.constant 1 : i32
    %74 = arith.addi %73, %c1_i32_45 : i32
    %c0_46 = arith.constant 0 : index
    %75 = arith.index_cast %74 : i32 to index
    %c0_47 = arith.constant 0 : index
    %76 = vector.load %arg2[%c0_46, %75, %c0_47] : memref<1x40x128xf32, #tpu.memory_space<vmem>>, vector<1x24x128xf32>
    %77 = vector.shape_cast %76 : vector<1x24x128xf32> to vector<24x128xf32>
    %78 = arith.truncf %77 : vector<24x128xf32> to vector<24x128xbf16>
    %c7 = arith.constant 7 : index
    %c0_48 = arith.constant 0 : index
    %c0_49 = arith.constant 0 : index
    %79 = vector.load %arg3[%c7, %c0_48, %c0_49] : memref<9x128x128xbf16, #tpu.memory_space<vmem>>, vector<1x128x128xbf16>
    %80 = vector.shape_cast %79 : vector<1x128x128xbf16> to vector<128x128xbf16>
    %cst_50 = arith.constant dense<0.000000e+00> : vector<24x128xf32>
    %81 = tpu.matmul %78, %80, %cst_50 {dimension_numbers = #tpu.dot_dimension_numbers<[1], [0], [0], [1], [0, 0, 1, 1], [], []>} : vector<24x128xbf16>, vector<128x128xbf16>, vector<24x128xf32> -> vector<24x128xf32>
    %82 = arith.addf %72, %81 : vector<24x128xf32>
    %c12_i32_51 = arith.constant 12 : i32
    %83 = arith.addi %1, %c12_i32_51 : i32
    %c2_i32_52 = arith.constant 2 : i32
    %84 = arith.addi %83, %c2_i32_52 : i32
    %c0_53 = arith.constant 0 : index
    %85 = arith.index_cast %84 : i32 to index
    %c0_54 = arith.constant 0 : index
    %86 = vector.load %arg2[%c0_53, %85, %c0_54] : memref<1x40x128xf32, #tpu.memory_space<vmem>>, vector<1x24x128xf32>
    %87 = vector.shape_cast %86 : vector<1x24x128xf32> to vector<24x128xf32>
    %88 = arith.truncf %87 : vector<24x128xf32> to vector<24x128xbf16>
    %c8 = arith.constant 8 : index
    %c0_55 = arith.constant 0 : index
    %c0_56 = arith.constant 0 : index
    %89 = vector.load %arg3[%c8, %c0_55, %c0_56] : memref<9x128x128xbf16, #tpu.memory_space<vmem>>, vector<1x128x128xbf16>
    %90 = vector.shape_cast %89 : vector<1x128x128xbf16> to vector<128x128xbf16>
    %cst_57 = arith.constant dense<0.000000e+00> : vector<24x128xf32>
    %91 = tpu.matmul %88, %90, %cst_57 {dimension_numbers = #tpu.dot_dimension_numbers<[1], [0], [0], [1], [0, 0, 1, 1], [], []>} : vector<24x128xbf16>, vector<128x128xbf16>, vector<24x128xf32> -> vector<24x128xf32>
    %92 = arith.addf %82, %91 : vector<24x128xf32>
    %c0_58 = arith.constant 0 : index
    %c0_59 = arith.constant 0 : index
    %93 = vector.load %arg4[%c0_58, %c0_59] : memref<1x128xf32, #tpu.memory_space<vmem>>, vector<1x128xf32>
    %94 = vector.broadcast %93 : vector<1x128xf32> to vector<24x128xf32>
    %95 = arith.addf %92, %94 : vector<24x128xf32>
    %cst_60 = arith.constant 0.000000e+00 : f32
    %96 = vector.broadcast %cst_60 : f32 to vector<24x128xf32>
    %97 = arith.maximumf %95, %96 : vector<24x128xf32>
    %c0_61 = arith.constant 0 : index
    %c0_62 = arith.constant 0 : index
    %c0_63 = arith.constant 0 : index
    %98 = vector.load %arg5[%c0_61, %c0_62, %c0_63] : memref<1x24x128xf32, #tpu.memory_space<vmem>>, vector<1x24x128xf32>
    %99 = vector.shape_cast %98 : vector<1x24x128xf32> to vector<24x128xf32>
    %100 = vector.shape_cast %97 : vector<24x128xf32> to vector<1x24x128xf32>
    tpu.vector_store %arg5[%c0_61, %c0_62, %c0_63], %100 {strides = array<i32>} : memref<1x24x128xf32, #tpu.memory_space<vmem>>, vector<1x24x128xf32>,
    return
  }
  func.func @transform_0(%arg0: i32, %arg1: i32) -> (i32, i32, i32) {
    %c0_i32 = arith.constant 0 : i32
    %c0_i32_0 = arith.constant 0 : i32
    %c0_i32_1 = arith.constant 0 : i32
    return %arg0, %c0_i32, %c0_i32_0 : i32, i32, i32
  }
  func.func @transform_1(%arg0: i32, %arg1: i32) -> (i32, i32, i32) {
    %c0_i32 = arith.constant 0 : i32
    %c0_i32_0 = arith.constant 0 : i32
    %c0_i32_1 = arith.constant 0 : i32
    %c0_i32_2 = arith.constant 0 : i32
    return %c0_i32, %c0_i32_0, %c0_i32_1 : i32, i32, i32
  }
  func.func @transform_2(%arg0: i32, %arg1: i32) -> (i32, i32) {
    %c0_i32 = arith.constant 0 : i32
    %c0_i32_0 = arith.constant 0 : i32
    %c0_i32_1 = arith.constant 0 : i32
    return %c0_i32, %c0_i32_0 : i32, i32
  }
  func.func @transform_3(%arg0: i32, %arg1: i32) -> (i32, i32, i32) {
    %c0_i32 = arith.constant 0 : i32
    %c0_i32_0 = arith.constant 0 : i32
    return %arg0, %arg1, %c0_i32 : i32, i32, i32
  }
}

</mosaic_0001>

<bundles_post_ra>
// kernel: cornet_v1_block.4
= control target key start
LH: loop header
LB: loop body
LE: loop exit
PB: predicated region body
PF: predicated region fallthrough
CT: control target
= control target key end

     0   :  { %s597_s15 = smov 0   ;;  %s599_s16 = smov 0   ;;  %s659_s0 = inlined_call_operand.vmem [shape: f32[2,32,128], index: 0, kind: input, shape index: {}]   ;;  %s660_s1 = inlined_call_operand.vmem [shape: f32[2,32,128], index: 1, kind: input, shape index: {}]   ;;  %s661_s2 = inlined_call_operand.vmem [shape: f32[2,32,128], index: 2, kind: input, shape index: {}]   ;;  %s662_s3 = inlined_call_operand.vmem [shape: f32[2,32,128], index: 3, kind: input, shape index: {}]   ;;  %s663_s4 = inlined_call_operand.vmem [shape: f32[2,24,128], index: 4, kind: output, shape index: {}]  }
   0x1   :  { %s601_s17 = smov 0  }
   0x2 LB: > { %s26_s18 = sadd.s32 1, %s566_s16  ;;  %p492_p0 = scmp.ge.s32.totalorder %s570_s17, 1  ;;  %s570_s17 = sphi %s601_s17, %s14_s17   ;;  %s566_s16 = sphi %s599_s16, %s665_s16   ;;  %s562_s15 = sphi %s597_s15, %s664_s15  }
   0x3   : > { %p28_p1 = scmp.ge.s32.totalorder %s26_s18, 2  ;;  %p206_p2 = scmp.lt.s32.totalorder %s570_s17, 3 }
   0x5   : > { %s667_s18 = smov (%p28_p1, %s26_s18), 0  ;;  %p207_p3 = pnand %p492_p0, %p206_p2 }
   0x6   : > { %p251_p4 = scmp.lt.s32.totalorder (!%p207_p3), %s562_s15, 1 }
   0x7   : > { %210 = sbr.rel (%p207_p3) target bundleno = 37 (0x25), region = 36 }
   0xe   : > { %s669_s15 = smov (!%p251_p4, %s562_s15), 1 }
   0xf   : > { %s519_s19 = sshll.u32 %s669_s15, 5  ;;  %s523_s6 = smul.u32 24, %s669_s15 }
  0x10   : > { %s255_s22 = scalar_lea.vmem %s659_s0, %s519_s19  ;;  %s624_s25 = scalar_lea.vmem %s660_s1, %s519_s19 }
  0x11   : > { %v283_v0 = vld [vmem:[%s255_s22] sm:$0xff]  ;;  %v284_v6 = vld [vmem:[%s255_s22 + $0x8] sm:$0xff]  ;;  %s630_s28 = scalar_lea.vmem %s661_s2, %s519_s19  ;;  %v285_v15 = vld [vmem:[%s255_s22 + $0x10] sm:$0xff]  ;;  %s270_s5 = scalar_lea.vmem %s662_s3, %s519_s19 }
  0x12   : > { %v502_v1 = vld [vmem:[%s255_s22 + $0x1] sm:$0xff]  ;;  %v503_v7 = vld [vmem:[%s255_s22 + $0x9] sm:$0xff]  ;;  %v504_v16 = vld [vmem:[%s255_s22 + $0x11] sm:$0xff]  ;;  %s279_s9 = scalar_lea.vmem %s663_s4, %s523_s6 }
  0x13   : > { %v505_v2 = vld [vmem:[%s255_s22 + $0x5] sm:$0xff]  ;;  %v291_v3 = vmax.f32 %v283_v0, %v502_v1  ;;  %v506_v8 = vld [vmem:[%s255_s22 + $0xd] sm:$0xff]  ;;  %v292_v10 = vmax.f32 %v284_v6, %v503_v7  ;;  %v507_v17 = vld [vmem:[%s255_s22 + $0x15] sm:$0xff]  ;;  %v293_v20 = vmax.f32 %v285_v15, %v504_v16 }
  0x14   : > { %v508_v4 = vld [vmem:[%s255_s22 + $0x6] sm:$0xff]  ;;  %v509_v13 = vld [vmem:[%s255_s22 + $0xe] sm:$0xff]  ;;  %v510_v23 = vld [vmem:[%s255_s22 + $0x16] sm:$0xff] }
  0x15   : > { %v299_v5 = vmax.f32 %v291_v3, %v505_v2  ;;  %v311_v9 = vld [vmem:[%s624_s25] sm:$0xff]  ;;  %v300_v14 = vmax.f32 %v292_v10, %v506_v8  ;;  %v312_v19 = vld [vmem:[%s624_s25 + $0x8] sm:$0xff]  ;;  %v301_v26 = vmax.f32 %v293_v20, %v507_v17  ;;  %v313_v29 = vld [vmem:[%s624_s25 + $0x10] sm:$0xff] }
  0x16   : > { %v511_v12 = vld [vmem:[%s624_s25 + $0x5] sm:$0xff]  ;;  %v512_v25 = vld [vmem:[%s624_s25 + $0xd] sm:$0xff]  ;;  %v513_v35 = vld [vmem:[%s624_s25 + $0x15] sm:$0xff] }
  0x17   : > { %v307_v11 = vmax.f32 %v299_v5, %v508_v4  ;;  %v325_v21 = vld [vmem:[%s630_s28] sm:$0xff]  ;;  %v308_v22 = vmax.f32 %v300_v14, %v509_v13  ;;  %v326_v31 = vld [vmem:[%s630_s28 + $0x8] sm:$0xff]  ;;  %v309_v32 = vmax.f32 %v301_v26, %v510_v23  ;;  %v327_v40 = vld [vmem:[%s630_s28 + $0x10] sm:$0xff] }
  0x18   : > { %v514_v27 = vld [vmem:[%s630_s28 + $0x1] sm:$0xff]  ;;  %v515_v37 = vld [vmem:[%s630_s28 + $0x9] sm:$0xff]  ;;  %v516_v45 = vld [vmem:[%s630_s28 + $0x11] sm:$0xff] }
  0x19   : > { %v314_v18 = vmax.f32 %v307_v11, %v311_v9  ;;  %v315_v28 = vmax.f32 %v308_v22, %v312_v19  ;;  %v339_v33 = vld [vmem:[%s270_s5] sm:$0xff]  ;;  %v316_v38 = vmax.f32 %v309_v32, %v313_v29  ;;  %v340_v42 = vld [vmem:[%s270_s5 + $0x8] sm:$0xff]  ;;  %v341_v48 = vld [vmem:[%s270_s5 + $0x10] sm:$0xff] }
  0x1b   : > { %v321_v24 = vmax.f32 %v314_v18, %v511_v12  ;;  %v322_v34 = vmax.f32 %v315_v28, %v512_v25  ;;  %v323_v43 = vmax.f32 %v316_v38, %v513_v35 }
  0x1d   : > { %v328_v30 = vmax.f32 %v321_v24, %v325_v21  ;;  %v329_v39 = vmax.f32 %v322_v34, %v326_v31  ;;  %v330_v46 = vmax.f32 %v323_v43, %v327_v40 }
  0x1f   : > { %v335_v36 = vmax.f32 %v328_v30, %v514_v27  ;;  %v336_v44 = vmax.f32 %v329_v39, %v515_v37  ;;  %v337_v49 = vmax.f32 %v330_v46, %v516_v45 }
  0x21   : > { %v342_v41 = vmax.f32 %v335_v36, %v339_v33  ;;  %v343_v47 = vmax.f32 %v336_v44, %v340_v42  ;;  %v344_v50 = vmax.f32 %v337_v49, %v341_v48 }
  0x23   : > { %345 = vst [vmem:[%s279_s9] sm:$0xff] %v342_v41  ;;  %346 = vst [vmem:[%s279_s9 + $0x8] sm:$0xff] %v343_v47 }
  0x24   : > { %347 = vst [vmem:[%s279_s9 + $0x10] sm:$0xff] %v344_v50 }
  0x25 PF: > { %s14_s17 = sadd.s32 1, %s570_s17   ;;  %s664_s15 = smov %s566_s16 }
  0x26   : > { %p11_p5 = scmp.ge.s32.totalorder %s14_s17, 4   ;;  %s665_s16 = smov %s667_s18 }
  0x28   :  { %13 = sbr.rel (!%p11_p5) target bundleno = 2 (0x2), region = 84 }

// kernel: cornet_v1_block.3
= control target key start
LH: loop header
LB: loop body
LE: loop exit
PB: predicated region body
PF: predicated region fallthrough
CT: control target
= control target key end

     0   :  { %v438_v0 = vmov 0   ;;  %vm186_vm0 = vcmask 195584   ;;  %vm211_vm1 = vcmask 1043456   ;;  %s614_s1 = inlined_call_operand.vmem [shape: bf16[152,128], index: 1, kind: input, shape index: {}]   ;;  %s615_s0 = inlined_call_operand.vmem [shape: bf16[128,152], index: 0, kind: input, shape index: {}]   ;;  %s616_s2 = inlined_call_operand.vmem [shape: f32[1,128], index: 2, kind: input, shape index: {}]   ;;  %s617_s3 = inlined_call_operand.vmem [shape: f32[128,128], index: 3, kind: output, shape index: {}]  }
   0x1   :  { %215 = vmatprep.subr.bf16.mxu0 %v438_v0  ;;  %383 = vmatprep.subr.bf16.mxu1 %v438_v0  ;;  %v404_v1 = vld [vmem:[%s614_s1] sm:$0xff]   ;;  %v405_v2 = vld [vmem:[%s614_s1 + $0x8] sm:$0xff]   ;;  %v406_v3 = vld [vmem:[%s614_s1 + $0x10] sm:$0xff]  }
   0x2   :  { %216 = vmatpush1.bf16.msra.mxu0 %v404_v1  ;;  %393 = vmatpush1.bf16.msra.mxu1 %v404_v1  ;;  %v407_v4 = vld [vmem:[%s614_s1 + $0x18] sm:$0xff]   ;;  %v416_v5 = vld [vmem:[%s615_s0 + $0x4] ss:$8 sps:$4 sm:$0xff]   ;;  %v410_v9 = vld [vmem:[%s614_s1 + $0x30] sm:$0xff]  }
   0x3   :  { %217 = vmatprep.subr.bf16.mxu0 %v438_v0  ;;  %384 = vmatprep.subr.bf16.mxu1 %v438_v0  ;;  %v419_v6 = vld [vmem:[%s615_s0 + $0x44] ss:$8 sps:$4 sm:$0xff]   ;;  %v411_v10 = vld [vmem:[%s614_s1 + $0x38] sm:$0xff]   ;;  %v413_v12 = vld [vmem:[%s614_s1 + $0x48] ss:$0 sps:$4 sm:$0xff]  }
   0x4   :  { %375 = vmatprep.mubr.msk.bf16.mxu0 %vm186_vm0, %v416_v5  ;;  %v408_v7 = vld [vmem:[%s614_s1 + $0x20] sm:$0xff]   ;;  %379 = vmatprep.mubr.msk.bf16.mxu1 %vm186_vm0, %v419_v6  ;;  %v409_v8 = vld [vmem:[%s614_s1 + $0x28] sm:$0xff]   ;;  %v213_v13 = vsel %vm211_vm1, %v413_v12, 0  ;;  %v420_v16 = vld [vmem:[%s615_s0 + $0x14] ss:$8 sps:$4 sm:$0xff]  }
   0x5   :  { %v412_v11 = vld [vmem:[%s614_s1 + $0x40] sm:$0xff]   ;;  %v422_v17 = vld [vmem:[%s615_s0 + $0x54] ss:$8 sps:$4 sm:$0xff]   ;;  %v424_v18 = vld [vmem:[%s615_s0 + $0x10] ss:$8 sps:$4 sm:$0xff]  }
   0x6   :  { %218 = vmatpush1.bf16.msra.mxu0 %v405_v2  ;;  %394 = vmatpush1.bf16.msra.mxu1 %v405_v2  ;;  %v414_v14 = vld [vmem:[%s615_s0] ss:$8 sps:$4 sm:$0xff]   ;;  %v425_v19 = vld [vmem:[%s615_s0 + $0x50] ss:$8 sps:$4 sm:$0xff]   ;;  %v426_v20 = vld [vmem:[%s615_s0 + $0x24] ss:$8 sps:$4 sm:$0xff]  }
   0x7   :  { %219 = vmatprep.subr.bf16.mxu0 %v438_v0  ;;  %385 = vmatprep.subr.bf16.mxu1 %v438_v0  ;;  %v417_v15 = vld [vmem:[%s615_s0 + $0x40] ss:$8 sps:$4 sm:$0xff]   ;;  %v428_v21 = vld [vmem:[%s615_s0 + $0x64] ss:$8 sps:$4 sm:$0xff]   ;;  %v432_v24 = vld [vmem:[%s615_s0 + $0x34] ss:$8 sps:$4 sm:$0xff]  }
   0x8   :  { %v430_v22 = vld [vmem:[%s615_s0 + $0x20] ss:$8 sps:$4 sm:$0xff]   ;;  %v434_v25 = vld [vmem:[%s615_s0 + $0x74] ss:$8 sps:$4 sm:$0xff]   ;;  %v436_v26 = vld [vmem:[%s615_s0 + $0x30] ss:$8 sps:$4 sm:$0xff]  }
   0x9   :  { %v431_v23 = vld [vmem:[%s615_s0 + $0x60] ss:$8 sps:$4 sm:$0xff]   ;;  %v437_v27 = vld [vmem:[%s615_s0 + $0x70] ss:$8 sps:$4 sm:$0xff]  }
   0xa   :  { %220 = vmatpush1.bf16.msra.mxu0 %v406_v3  ;;  %395 = vmatpush1.bf16.msra.mxu1 %v406_v3  ;;  %v548_v28 = vld [vmem:[%s616_s2] ss:$0 sm:$0xff] }
   0xb   :  { %221 = vmatprep.subr.bf16.mxu0 %v438_v0  ;;  %386 = vmatprep.subr.bf16.mxu1 %v438_v0 }
   0xe   :  { %222 = vmatpush1.bf16.msra.mxu0 %v407_v4  ;;  %396 = vmatpush1.bf16.msra.mxu1 %v407_v4 }
   0xf   :  { %223 = vmatprep.subr.bf16.mxu0 %v438_v0  ;;  %387 = vmatprep.subr.bf16.mxu1 %v438_v0 }
  0x12   :  { %224 = vmatpush1.bf16.msra.mxu0 %v408_v7  ;;  %397 = vmatpush1.bf16.msra.mxu1 %v408_v7 }
  0x13   :  { %225 = vmatprep.subr.bf16.mxu0 %v438_v0  ;;  %388 = vmatprep.subr.bf16.mxu1 %v438_v0 }
  0x16   :  { %226 = vmatpush1.bf16.msra.mxu0 %v409_v8  ;;  %398 = vmatpush1.bf16.msra.mxu1 %v409_v8 }
  0x17   :  { %227 = vmatprep.subr.bf16.mxu0 %v438_v0  ;;  %389 = vmatprep.subr.bf16.mxu1 %v438_v0 }
  0x1a   :  { %228 = vmatpush1.bf16.msra.mxu0 %v410_v9  ;;  %399 = vmatpush1.bf16.msra.mxu1 %v410_v9 }
  0x1b   :  { %229 = vmatprep.subr.bf16.mxu0 %v438_v0  ;;  %390 = vmatprep.subr.bf16.mxu1 %v438_v0 }
  0x1e   :  { %230 = vmatpush1.bf16.msra.mxu0 %v411_v10  ;;  %400 = vmatpush1.bf16.msra.mxu1 %v411_v10 }
  0x1f   :  { %231 = vmatprep.subr.bf16.mxu0 %v438_v0  ;;  %391 = vmatprep.subr.bf16.mxu1 %v438_v0 }
  0x22   :  { %232 = vmatpush1.bf16.msra.mxu0 %v412_v11  ;;  %401 = vmatpush1.bf16.msra.mxu1 %v412_v11 }
  0x23   :  { %233 = vmatprep.subr.bf16.mxu0 %v438_v0  ;;  %392 = vmatprep.subr.bf16.mxu1 %v438_v0 }
  0x26   :  { %234 = vmatpush1.bf16.msra.mxu0 %v213_v13  ;;  %402 = vmatpush1.bf16.msra.mxu1 %v213_v13 }
  0x29   :  { %248 = vmatmul.mubr.bf16.vlgmr.msra.gmra.mrb[0].mxu0 %v414_v14  ;;  %280 = vmatmul.mubr.bf16.vlgmr.msra.gmra.mrb[0].mxu1 %v417_v15 }
  0x2a   :  { %376 = vmatprep.mubr.msk.bf16.mxu0 %vm186_vm0, %v420_v16  ;;  %380 = vmatprep.mubr.msk.bf16.mxu1 %vm186_vm0, %v422_v17 }
  0x31   :  { %256 = vmatmul.mubr.bf16.gmra.mrb[4].mxu0 %v424_v18  ;;  %288 = vmatmul.mubr.bf16.gmra.mrb[4].mxu1 %v425_v19 }
  0x32   :  { %377 = vmatprep.mubr.msk.bf16.mxu0 %vm186_vm0, %v426_v20  ;;  %381 = vmatprep.mubr.msk.bf16.mxu1 %vm186_vm0, %v428_v21 }
  0x39   :  { %264 = vmatmul.mubr.bf16.gmra.mrb[8].mxu0 %v430_v22  ;;  %296 = vmatmul.mubr.bf16.gmra.mrb[8].mxu1 %v431_v23 }
  0x3a   :  { %378 = vmatprep.mubr.msk.bf16.mxu0 %vm186_vm0, %v432_v24  ;;  %382 = vmatprep.mubr.msk.bf16.mxu1 %vm186_vm0, %v434_v25 }
  0x41   :  { %272 = vmatmul.mubr.bf16.gmra.mrb[12].mxu0 %v436_v26  ;;  %304 = vmatmul.mubr.bf16.gmra.mrb[12].mxu1 %v437_v27 }
  0xfc   :  { %v249_v29 = vpop.f32.mrb[0].mxu0  ;;  %v281_v30 = vpop.f32.mrb[0].mxu1 }
  0xfd   :  { %v250_v31 = vadd.f32 %v548_v28, %v249_v29  ;;  %v282_v32 = vadd.f32 %v548_v28, %v281_v30  ;;  %v251_v33 = vpop.f32.mrb[1].mxu0  ;;  %v283_v34 = vpop.f32.mrb[1].mxu1 }
  0xfe   :  { %v252_v35 = vpop.f32.mrb[2].mxu0  ;;  %v284_v36 = vpop.f32.mrb[2].mxu1 }
  0xff   :  { %v312_v37 = vmax.f32 %v250_v31, 0.0  ;;  %v320_v38 = vmax.f32 %v282_v32, 0.0  ;;  %v253_v39 = vadd.f32 %v548_v28, %v252_v35  ;;  %v285_v40 = vadd.f32 %v548_v28, %v284_v36  ;;  %v254_v41 = vpop.f32.mrb[3].mxu0  ;;  %v286_v42 = vpop.f32.mrb[3].mxu1 }
 0x101   :  { %328 = vst [vmem:[%s617_s3] sm:$0xff] %v312_v37  ;;  %336 = vst [vmem:[%s617_s3 + $0x40] sm:$0xff] %v320_v38  ;;  %v313_v43 = vmax.f32 %v253_v39, 0.0  ;;  %v321_v44 = vmax.f32 %v285_v40, 0.0 }
 0x103   :  { %329 = vst [vmem:[%s617_s3 + $0x8] sm:$0xff] %v313_v43  ;;  %337 = vst [vmem:[%s617_s3 + $0x48] sm:$0xff] %v321_v44 }
 0x104   :  { %v257_v45 = vpop.f32.mrb[4].mxu0  ;;  %v289_v46 = vpop.f32.mrb[4].mxu1 }
 0x105   :  { %v258_v47 = vadd.f32 %v548_v28, %v257_v45  ;;  %v290_v48 = vadd.f32 %v548_v28, %v289_v46  ;;  %v259_v49 = vpop.f32.mrb[5].mxu0  ;;  %v291_v50 = vpop.f32.mrb[5].mxu1 }
 0x106   :  { %v260_v51 = vpop.f32.mrb[6].mxu0  ;;  %v292_v52 = vpop.f32.mrb[6].mxu1 }
 0x107   :  { %v314_v53 = vmax.f32 %v258_v47, 0.0  ;;  %v322_v54 = vmax.f32 %v290_v48, 0.0  ;;  %v261_v55 = vadd.f32 %v548_v28, %v260_v51  ;;  %v293_v56 = vadd.f32 %v548_v28, %v292_v52  ;;  %v262_v57 = vpop.f32.mrb[7].mxu0  ;;  %v294_v58 = vpop.f32.mrb[7].mxu1 }
 0x109   :  { %330 = vst [vmem:[%s617_s3 + $0x10] sm:$0xff] %v314_v53  ;;  %338 = vst [vmem:[%s617_s3 + $0x50] sm:$0xff] %v322_v54  ;;  %v315_v59 = vmax.f32 %v261_v55, 0.0  ;;  %v323_v60 = vmax.f32 %v293_v56, 0.0 }
 0x10b   :  { %331 = vst [vmem:[%s617_s3 + $0x18] sm:$0xff] %v315_v59  ;;  %339 = vst [vmem:[%s617_s3 + $0x58] sm:$0xff] %v323_v60 }
 0x10c   :  { %v265_v61 = vpop.f32.mrb[8].mxu0  ;;  %v297_v62 = vpop.f32.mrb[8].mxu1 }
 0x10d   :  { %v266_v63 = vadd.f32 %v548_v28, %v265_v61  ;;  %v298_v0 = vadd.f32 %v548_v28, %v297_v62  ;;  %v267_v1 = vpop.f32.mrb[9].mxu0  ;;  %v299_v2 = vpop.f32.mrb[9].mxu1 }
 0x10e   :  { %v268_v3 = vpop.f32.mrb[10].mxu0  ;;  %v300_v4 = vpop.f32.mrb[10].mxu1 }
 0x10f   :  { %v316_v5 = vmax.f32 %v266_v63, 0.0  ;;  %v324_v6 = vmax.f32 %v298_v0, 0.0  ;;  %v269_v7 = vadd.f32 %v548_v28, %v268_v3  ;;  %v301_v8 = vadd.f32 %v548_v28, %v300_v4  ;;  %v270_v9 = vpop.f32.mrb[11].mxu0  ;;  %v302_v10 = vpop.f32.mrb[11].mxu1 }
 0x111   :  { %332 = vst [vmem:[%s617_s3 + $0x20] sm:$0xff] %v316_v5  ;;  %340 = vst [vmem:[%s617_s3 + $0x60] sm:$0xff] %v324_v6  ;;  %v317_v11 = vmax.f32 %v269_v7, 0.0  ;;  %v325_v12 = vmax.f32 %v301_v8, 0.0 }
 0x113   :  { %333 = vst [vmem:[%s617_s3 + $0x28] sm:$0xff] %v317_v11  ;;  %341 = vst [vmem:[%s617_s3 + $0x68] sm:$0xff] %v325_v12 }
 0x114   :  { %v273_v13 = vpop.f32.mrb[12].mxu0  ;;  %v305_v14 = vpop.f32.mrb[12].mxu1 }
 0x115   :  { %v274_v15 = vadd.f32 %v548_v28, %v273_v13  ;;  %v306_v16 = vadd.f32 %v548_v28, %v305_v14  ;;  %v275_v17 = vpop.f32.mrb[13].mxu0  ;;  %v307_v18 = vpop.f32.mrb[13].mxu1 }
 0x116   :  { %v276_v19 = vpop.f32.mrb[14].mxu0  ;;  %v308_v20 = vpop.f32.mrb[14].mxu1 }
 0x117   :  { %v318_v21 = vmax.f32 %v274_v15, 0.0  ;;  %v326_v22 = vmax.f32 %v306_v16, 0.0  ;;  %v277_v23 = vadd.f32 %v548_v28, %v276_v19  ;;  %v309_v24 = vadd.f32 %v548_v28, %v308_v20  ;;  %v278_v25 = vpop.f32.mrb[15].mxu0  ;;  %v310_v26 = vpop.f32.mrb[15].mxu1 }
 0x119   :  { %334 = vst [vmem:[%s617_s3 + $0x30] sm:$0xff] %v318_v21  ;;  %342 = vst [vmem:[%s617_s3 + $0x70] sm:$0xff] %v326_v22  ;;  %v319_v27 = vmax.f32 %v277_v23, 0.0  ;;  %v327_v29 = vmax.f32 %v309_v24, 0.0 }
 0x11b   :  { %335 = vst [vmem:[%s617_s3 + $0x38] sm:$0xff] %v319_v27  ;;  %343 = vst [vmem:[%s617_s3 + $0x78] sm:$0xff] %v327_v29 }

// kernel: cornet_v1_block.5
= control target key start
LH: loop header
LB: loop body
LE: loop exit
PB: predicated region body
PF: predicated region fallthrough
CT: control target
= control target key end

     0   :  { %s2064_s12 = smov 0   ;;  %s2066_s13 = smov 0   ;;  %s2366_s0 = inlined_call_operand.vmem [shape: f32[2,40,128], index: 0, kind: input, shape index: {}]   ;;  %s2367_s1 = inlined_call_operand.vmem [shape: bf16[9,128,128], index: 1, kind: input, shape index: {}]   ;;  %s2368_s2 = inlined_call_operand.vmem [shape: f32[1,128], index: 2, kind: input, shape index: {}]   ;;  %s2369_s3 = inlined_call_operand.vmem [shape: f32[2,24,128], index: 3, kind: output, shape index: {}]  }
   0x1   :  { %s2068_s14 = smov 0  }
   0x2 LB: > { %s25_s15 = sadd.s32 1, %s2038_s13  ;;  %p1422_p0 = scmp.ge.s32.totalorder %s2042_s14, 1  ;;  %s2042_s14 = sphi %s2068_s14, %s13_s14   ;;  %s2038_s13 = sphi %s2066_s13, %s2371_s13   ;;  %s2034_s12 = sphi %s2064_s12, %s2370_s12  }
   0x3   : > { %p27_p1 = scmp.ge.s32.totalorder %s25_s15, 2  ;;  %p151_p2 = scmp.lt.s32.totalorder %s2042_s14, 3 }
   0x5   : > { %s2373_s15 = smov (%p27_p1, %s25_s15), 0  ;;  %p152_p3 = pnand %p1422_p0, %p151_p2 }
   0x6   : > { %v1948_v0 = vld [vmem:[%s2367_s1 + $0x40] sm:$0xff] (!%p152_p3)   ;;  %p179_p4 = scmp.lt.s32.totalorder (!%p152_p3), %s2034_s12, 1  ;;  %v1950_v2 = vld [vmem:[%s2367_s1 + $0x48] sm:$0xff] (!%p152_p3)   ;;  %v1952_v4 = vld [vmem:[%s2367_s1 + $0x50] sm:$0xff] (!%p152_p3)  }
   0x7   : > { %155 = sbr.rel (%p152_p3) target bundleno = 389 (0x185), region = 32  ;;  %v1949_v1 = vld [vmem:[%s2367_s1] sm:$0xff] (!%p152_p3)   ;;  %1742 = vmatprep.subr.bf16.mxu0 (!%p152_p3), %v1948_v0  ;;  %v1951_v3 = vld [vmem:[%s2367_s1 + $0x8] sm:$0xff] (!%p152_p3)   ;;  %v1953_v5 = vld [vmem:[%s2367_s1 + $0x10] sm:$0xff] (!%p152_p3)  }
   0x8   : > { %1762 = vmatprep.subr.bf16.mxu1 (!%p152_p3), %v1949_v1  ;;  %1743 = vmatpush3.bf16.msra.mxu0 (!%p152_p3), %v1948_v0  ;;  %v1954_v6 = vld [vmem:[%s2367_s1 + $0x58] sm:$0xff] (!%p152_p3)   ;;  %v1956_v8 = vld [vmem:[%s2367_s1 + $0x60] sm:$0xff] (!%p152_p3)   ;;  %v1958_v10 = vld [vmem:[%s2367_s1 + $0x68] sm:$0xff] (!%p152_p3)  }
   0x9   : > { %1763 = vmatpush3.bf16.msra.mxu1 (!%p152_p3), %v1949_v1  ;;  %1744 = vmatprep.subr.bf16.mxu0 (!%p152_p3), %v1950_v2  ;;  %v1955_v7 = vld [vmem:[%s2367_s1 + $0x18] sm:$0xff] (!%p152_p3)   ;;  %v1957_v9 = vld [vmem:[%s2367_s1 + $0x20] sm:$0xff] (!%p152_p3)   ;;  %v1959_v14 = vld [vmem:[%s2367_s1 + $0x28] sm:$0xff] (!%p152_p3)  }
   0xa   : > { %1764 = vmatprep.subr.bf16.mxu1 (!%p152_p3), %v1951_v3  ;;  %v1960_v18 = vld [vmem:[%s2367_s1 + $0x70] sm:$0xff] (!%p152_p3)   ;;  %v1962_v20 = vld [vmem:[%s2367_s1 + $0x78] sm:$0xff] (!%p152_p3)   ;;  %v1964_v24 = vld [vmem:[%s2367_s1 + $0x80] sm:$0xff] (!%p152_p3)  }
   0xb   : > { %v1961_v19 = vld [vmem:[%s2367_s1 + $0x30] sm:$0xff] (!%p152_p3)   ;;  %v1963_v21 = vld [vmem:[%s2367_s1 + $0x38] sm:$0xff] (!%p152_p3)   ;;  %v1965_v25 = vld [vmem:[%s2367_s1 + $0xc0] sm:$0xff] (!%p152_p3)  }
   0xc   : > { %1745 = vmatpush3.bf16.msra.mxu0 (!%p152_p3), %v1950_v2  ;;  %v1966_v28 = vld [vmem:[%s2367_s1 + $0x88] sm:$0xff] (!%p152_p3)   ;;  %v1968_v32 = vld [vmem:[%s2367_s1 + $0x90] sm:$0xff] (!%p152_p3)   ;;  %v1970_v40 = vld [vmem:[%s2367_s1 + $0x98] sm:$0xff] (!%p152_p3)  }
   0xd   : > { %1765 = vmatpush3.bf16.msra.mxu1 (!%p152_p3), %v1951_v3  ;;  %1746 = vmatprep.subr.bf16.mxu0 (!%p152_p3), %v1952_v4  ;;  %v1967_v29 = vld [vmem:[%s2367_s1 + $0xc8] sm:$0xff] (!%p152_p3)   ;;  %v1969_v37 = vld [vmem:[%s2367_s1 + $0xd0] sm:$0xff] (!%p152_p3)   ;;  %v1971_v41 = vld [vmem:[%s2367_s1 + $0xd8] sm:$0xff] (!%p152_p3)  }
   0xe   : > { %s2375_s12 = smov (!%p179_p4, %s2034_s12), 1  ;;  %1766 = vmatprep.subr.bf16.mxu1 %v1953_v5  ;;  %v1972_v42 = vld [vmem:[%s2367_s1 + $0xa0] sm:$0xff]   ;;  %v1974_v44 = vld [vmem:[%s2367_s1 + $0xa8] sm:$0xff]   ;;  %v1976_v46 = vld [vmem:[%s2367_s1 + $0xb0] sm:$0xff]  }
   0xf   : > { %s1922_s5 = smul.u32 40, %s2375_s12  ;;  %v1973_v43 = vld [vmem:[%s2367_s1 + $0xe0] sm:$0xff]   ;;  %v1975_v45 = vld [vmem:[%s2367_s1 + $0xe8] sm:$0xff]   ;;  %v1977_v47 = vld [vmem:[%s2367_s1 + $0xf0] sm:$0xff]  }
  0x10   : > { %1747 = vmatpush3.bf16.msra.mxu0 %v1952_v4  ;;  %v1978_v48 = vld [vmem:[%s2367_s1 + $0xb8] sm:$0xff]   ;;  %v1980_v51 = vld [vmem:[%s2367_s1 + $0x100] sm:$0xff]   ;;  %v1982_v57 = vld [vmem:[%s2367_s1 + $0x108] sm:$0xff]  }
  0x11   : > { %1767 = vmatpush3.bf16.msra.mxu1 %v1953_v5  ;;  %1748 = vmatprep.subr.bf16.mxu0 %v1954_v6  ;;  %s2118_s16 = scalar_lea.vmem %s2366_s0, %s1922_s5  ;;  %v1979_v49 = vld [vmem:[%s2367_s1 + $0xf8] sm:$0xff]   ;;  %v1981_v52 = vld [vmem:[%s2367_s1 + $0x140] sm:$0xff]   ;;  %v1983_v58 = vld [vmem:[%s2367_s1 + $0x148] sm:$0xff]  }
  0x12   : > { %1768 = vmatprep.subr.bf16.mxu1 %v1955_v7  ;;  %v1425_v11 = vld [vmem:[%s2118_s16 + $0x1] sm:$0xff]  ;;  %v1426_v12 = vld [vmem:[%s2118_s16 + $0x9] sm:$0xff]  ;;  %v1427_v22 = vld [vmem:[%s2118_s16 + $0x11] sm:$0xff] }
  0x13   : > { %v197_v13 = vld [vmem:[%s2118_s16] sm:$0xff]  ;;  %v223_v15 = vpack.c.bf16 %v1426_v12, %v1425_v11  ;;  %v2130_v16 = vld [vmem:[%s2118_s16 + $0x8] sm:$0xff]  ;;  %v2147_v23 = vld [vmem:[%s2118_s16 + $0x10] sm:$0xff]  ;;  %v224_v26 = vpack.c.bf16 %v1427_v22, %v1427_v22 }
  0x14   : > { %1749 = vmatpush3.bf16.msra.mxu0 %v1954_v6  ;;  %v200_v17 = vpack.c.bf16 %v2130_v16, %v197_v13  ;;  %v201_v27 = vpack.c.bf16 %v2147_v23, %v2147_v23  ;;  %v1460_v30 = vld [vmem:[%s2118_s16 + $0x2] sm:$0xff]  ;;  %v1461_v31 = vld [vmem:[%s2118_s16 + $0xa] sm:$0xff]  ;;  %v2173_v36 = vld [vmem:[%s2118_s16 + $0x16] sm:$0xff]  ;;  %v808_v60 = vpack.c.bf16 %v2147_v23, %v2130_v16 }
  0x15   : > { %1769 = vmatpush3.bf16.msra.mxu1 %v1955_v7  ;;  %1750 = vmatprep.subr.bf16.mxu0 %v1956_v8  ;;  %v439_v33 = vpack.c.bf16 %v1461_v31, %v1460_v30  ;;  %v1487_v34 = vld [vmem:[%s2118_s16 + $0x6] sm:$0xff]  ;;  %v2170_v35 = vld [vmem:[%s2118_s16 + $0xe] sm:$0xff]  ;;  %v563_v56 = vpack.c.bf16 %v2173_v36, %v2173_v36  ;;  %v1986_v63 = vld [vmem:[%s2367_s1 + $0x118] sm:$0xff]  }
  0x16   : > { %1770 = vmatprep.subr.bf16.mxu1 %v1957_v9  ;;  %1758 = vmatprep.mubr.bf16.mxu0 %v223_v15  ;;  %v562_v38 = vpack.c.bf16 %v2170_v35, %v1487_v34  ;;  %v1177_v39 = vpack.c.bf16 %v2173_v36, %v2170_v35  ;;  %v1462_v50 = vld [vmem:[%s2118_s16 + $0x12] sm:$0xff]  ;;  %v1514_v53 = vld [vmem:[%s2118_s16 + $0x7] sm:$0xff] }
  0x17   : > { %1778 = vmatprep.mubr.bf16.mxu1 %v200_v17  ;;  %v440_v54 = vpack.c.bf16 %v1462_v50, %v1462_v50  ;;  %v1515_v55 = vld [vmem:[%s2118_s16 + $0xf] sm:$0xff]  ;;  %v1987_v0 = vld [vmem:[%s2367_s1 + $0x158] sm:$0xff]   ;;  %v1988_v1 = vld [vmem:[%s2367_s1 + $0x120] sm:$0xff]  }
  0x18   : > { %1751 = vmatpush3.bf16.msra.mxu0 %v1956_v8  ;;  %v685_v59 = vpack.c.bf16 %v1515_v55, %v1514_v53  ;;  %v1984_v61 = vld [vmem:[%s2367_s1 + $0x110] sm:$0xff]   ;;  %v1989_v2 = vld [vmem:[%s2367_s1 + $0x160] sm:$0xff]   ;;  %v1990_v3 = vld [vmem:[%s2367_s1 + $0x128] sm:$0xff]  }
  0x19   : > { %1771 = vmatpush3.bf16.msra.mxu1 %v1957_v9  ;;  %1752 = vmatprep.subr.bf16.mxu0 %v1958_v10  ;;  %v1985_v62 = vld [vmem:[%s2367_s1 + $0x150] sm:$0xff]   ;;  %v1991_v4 = vld [vmem:[%s2367_s1 + $0x168] sm:$0xff]   ;;  %v1994_v7 = vld [vmem:[%s2367_s1 + $0x138] sm:$0xff]  }
  0x1a   : > { %1772 = vmatprep.subr.bf16.mxu1 %v1959_v14  ;;  %v1992_v5 = vld [vmem:[%s2367_s1 + $0x130] sm:$0xff]   ;;  %v1995_v8 = vld [vmem:[%s2367_s1 + $0x178] sm:$0xff]   ;;  %v1997_v12 = vld [vmem:[%s2367_s1 + $0x1c0] sm:$0xff]  }
  0x1b   : > { %v1993_v6 = vld [vmem:[%s2367_s1 + $0x170] sm:$0xff]   ;;  %v1543_v11 = vld [vmem:[%s2118_s16 + $0x18] sm:$0xff]  ;;  %v2007_v30 = vld [vmem:[%s2367_s1 + $0x1e8] sm:$0xff]  }
  0x1c   : > { %1753 = vmatpush3.bf16.msra.mxu0 %v1958_v10  ;;  %v1516_v9 = vld [vmem:[%s2118_s16 + $0x17] sm:$0xff]  ;;  %v1996_v10 = vld [vmem:[%s2367_s1 + $0x180] sm:$0xff]   ;;  %v809_v16 = vpack.c.bf16 %v1543_v11, %v1543_v11  ;;  %v1595_v17 = vld [vmem:[%s2118_s16 + $0xd] sm:$0xff] }
  0x1d   : > { %1773 = vmatpush3.bf16.msra.mxu1 %v1959_v14  ;;  %1754 = vmatprep.subr.bf16.mxu0 %v1960_v18  ;;  %v686_v13 = vpack.c.bf16 %v1516_v9, %v1516_v9  ;;  %v1568_v14 = vld [vmem:[%s2118_s16 + $0xc] sm:$0xff]  ;;  %v1569_v15 = vld [vmem:[%s2118_s16 + $0x14] sm:$0xff] }
  0x1e   : > { %1774 = vmatprep.subr.bf16.mxu1 %v1961_v19  ;;  %v2000_v23 = vld [vmem:[%s2367_s1 + $0x190] sm:$0xff]   ;;  %v2011_v34 = vld [vmem:[%s2367_s1 + $0x1f8] sm:$0xff]   ;;  %v2017_v35 = vld [vmem:[%s2367_s1 + $0x228] sm:$0xff]  }
  0x1f   : > { %v2008_v31 = vld [vmem:[%s2367_s1 + $0x1b0] sm:$0xff]  }
  0x20   : > { %1755 = vmatpush3.bf16.msra.mxu0 %v1960_v18  ;;  %v1596_v18 = vld [vmem:[%s2118_s16 + $0x15] sm:$0xff] }
  0x21   : > { %1775 = vmatpush3.bf16.msra.mxu1 %v1961_v19  ;;  %1756 = vmatprep.subr.bf16.mxu0 %v1962_v20  ;;  %v1998_v19 = vld [vmem:[%s2367_s1 + $0x188] sm:$0xff]   ;;  %v1054_v22 = vpack.c.bf16 %v1596_v18, %v1595_v17  ;;  %v2018_v36 = vld [vmem:[%s2367_s1 + $0x230] sm:$0xff]  }
  0x22   : > { %1776 = vmatprep.subr.bf16.mxu1 %v1963_v21 }
  0x24   : > { %1757 = vmatpush3.bf16.msra.mxu0 %v1962_v20  ;;  %v1999_v20 = vld [vmem:[%s2367_s1 + $0x1c8] sm:$0xff]  }
  0x25   : > { %1777 = vmatpush3.bf16.msra.mxu1 %v1963_v21  ;;  %1782 = vmatprep.subr.bf16.mxu0 %v1964_v24  ;;  %v931_v21 = vpack.c.bf16 %v1569_v15, %v1568_v14 }
  0x26   : > { %1802 = vmatprep.subr.bf16.mxu1 %v1965_v25 }
  0x27   : > { %1759 = vmatmul.mubr.bf16.vlgmr.msra.gmra.mrb[0].mxu0 %v224_v26  ;;  %v2003_v26 = vld [vmem:[%s2367_s1 + $0x1d8] sm:$0xff]  }
  0x28   : > { %1779 = vmatmul.mubr.bf16.vlgmr.msra.gmra.mrb[0].mxu1 %v201_v27  ;;  %1783 = vmatpush3.bf16.msra.mxu0 %v1964_v24  ;;  %v2001_v24 = vld [vmem:[%s2367_s1 + $0x1d0] sm:$0xff]   ;;  %v2004_v27 = vld [vmem:[%s2367_s1 + $0x1a0] sm:$0xff]  }
  0x29   : > { %1803 = vmatpush3.bf16.msra.mxu1 %v1965_v25  ;;  %1784 = vmatprep.subr.bf16.mxu0 %v1966_v28  ;;  %v2002_v25 = vld [vmem:[%s2367_s1 + $0x198] sm:$0xff]  }
  0x2a   : > { %1804 = vmatprep.subr.bf16.mxu1 %v1967_v29  ;;  %1798 = vmatprep.mubr.bf16.mxu0 %v439_v33  ;;  %v2010_v33 = vld [vmem:[%s2367_s1 + $0x1b8] sm:$0xff]  }
  0x2b   : > { %1818 = vmatprep.mubr.bf16.mxu1 %v562_v38  ;;  %v2012_v38 = vld [vmem:[%s2367_s1 + $0x200] sm:$0xff]  }
  0x2c   : > { %1785 = vmatpush3.bf16.msra.mxu0 %v1966_v28  ;;  %v2005_v28 = vld [vmem:[%s2367_s1 + $0x1e0] sm:$0xff]  }
  0x2d   : > { %1805 = vmatpush3.bf16.msra.mxu1 %v1967_v29  ;;  %1786 = vmatprep.subr.bf16.mxu0 %v1968_v32  ;;  %v2006_v29 = vld [vmem:[%s2367_s1 + $0x1a8] sm:$0xff]  }
  0x2e   : > { %1806 = vmatprep.subr.bf16.mxu1 %v1969_v37 }
  0x30   : > { %1787 = vmatpush3.bf16.msra.mxu0 %v1968_v32  ;;  %v2009_v32 = vld [vmem:[%s2367_s1 + $0x1f0] sm:$0xff]  }
  0x31   : > { %1807 = vmatpush3.bf16.msra.mxu1 %v1969_v37  ;;  %1788 = vmatprep.subr.bf16.mxu0 %v1970_v40  ;;  %v1570_v37 = vld [vmem:[%s2118_s16 + $0x1c] sm:$0xff] }
  0x32   : > { %1808 = vmatprep.subr.bf16.mxu1 %v1971_v41 }
  0x34   : > { %1789 = vmatpush3.bf16.msra.mxu0 %v1970_v40  ;;  %v1597_v40 = vld [vmem:[%s2118_s16 + $0x1d] sm:$0xff] }
  0x35   : > { %1809 = vmatpush3.bf16.msra.mxu1 %v1971_v41  ;;  %1790 = vmatprep.subr.bf16.mxu0 %v1972_v42  ;;  %v932_v41 = vpack.c.bf16 %v1570_v37, %v1570_v37 }
  0x36   : > { %1810 = vmatprep.subr.bf16.mxu1 %v1973_v43 }
  0x38   : > { %1791 = vmatpush3.bf16.msra.mxu0 %v1972_v42  ;;  %v1055_v42 = vpack.c.bf16 %v1597_v40, %v1597_v40 }
  0x39   : > { %1811 = vmatpush3.bf16.msra.mxu1 %v1973_v43  ;;  %1792 = vmatprep.subr.bf16.mxu0 %v1974_v44  ;;  %v2013_v43 = vld [vmem:[%s2367_s1 + $0x208] sm:$0xff]  }
  0x3a   : > { %1812 = vmatprep.subr.bf16.mxu1 %v1975_v45 }
  0x3c   : > { %1793 = vmatpush3.bf16.msra.mxu0 %v1974_v44  ;;  %v2014_v44 = vld [vmem:[%s2367_s1 + $0x210] sm:$0xff]  }
  0x3d   : > { %1813 = vmatpush3.bf16.msra.mxu1 %v1975_v45  ;;  %1794 = vmatprep.subr.bf16.mxu0 %v1976_v46  ;;  %v2015_v45 = vld [vmem:[%s2367_s1 + $0x218] sm:$0xff]  }
  0x3e   : > { %1814 = vmatprep.subr.bf16.mxu1 %v1977_v47 }
  0x40   : > { %1795 = vmatpush3.bf16.msra.mxu0 %v1976_v46  ;;  %v2016_v46 = vld [vmem:[%s2367_s1 + $0x220] sm:$0xff]  }
  0x41   : > { %1815 = vmatpush3.bf16.msra.mxu1 %v1977_v47  ;;  %1796 = vmatprep.subr.bf16.mxu0 %v1978_v48  ;;  %v1624_v47 = vld [vmem:[%s2118_s16 + $0x1e] sm:$0xff]  ;;  %s1923_s16 = smul.u32 24, %s2375_s12 }
  0x42   : > { %1816 = vmatprep.subr.bf16.mxu1 %v1979_v49 }
  0x43   : > { %s192_s8 = scalar_lea.vmem %s2369_s3, %s1923_s16 }
  0x44   : > { %1797 = vmatpush3.bf16.msra.mxu0 %v1978_v48  ;;  %v1178_v48 = vpack.c.bf16 %v1624_v47, %v1624_v47 }
  0x45   : > { %1817 = vmatpush3.bf16.msra.mxu1 %v1979_v49  ;;  %1822 = vmatprep.subr.bf16.mxu0 %v1980_v51 }
  0x46   : > { %1842 = vmatprep.subr.bf16.mxu1 %v1981_v52 }
  0x47   : > { %1799 = vmatmul.mubr.bf16.vlgmr.msra.gmra.mrb[4].mxu0 %v440_v54 }
  0x48   : > { %1823 = vmatpush3.bf16.msra.mxu0 %v1980_v51  ;;  %1819 = vmatmul.mubr.bf16.vlgmr.msra.gmra.mrb[4].mxu1 %v563_v56 }
  0x49   : > { %1843 = vmatpush3.bf16.msra.mxu1 %v1981_v52  ;;  %1824 = vmatprep.subr.bf16.mxu0 %v1982_v57 }
  0x4a   : > { %1844 = vmatprep.subr.bf16.mxu1 %v1983_v58  ;;  %1838 = vmatprep.mubr.bf16.mxu0 %v685_v59 }
  0x4b   : > { %1858 = vmatprep.mubr.bf16.mxu1 %v808_v60 }
  0x4c   : > { %1825 = vmatpush3.bf16.msra.mxu0 %v1982_v57 }
  0x4d   : > { %1845 = vmatpush3.bf16.msra.mxu1 %v1983_v58  ;;  %1826 = vmatprep.subr.bf16.mxu0 %v1984_v61 }
  0x4e   : > { %1846 = vmatprep.subr.bf16.mxu1 %v1985_v62 }
  0x50   : > { %1827 = vmatpush3.bf16.msra.mxu0 %v1984_v61 }
  0x51   : > { %1847 = vmatpush3.bf16.msra.mxu1 %v1985_v62  ;;  %1828 = vmatprep.subr.bf16.mxu0 %v1986_v63 }
  0x52   : > { %1848 = vmatprep.subr.bf16.mxu1 %v1987_v0 }
  0x54   : > { %1829 = vmatpush3.bf16.msra.mxu0 %v1986_v63 }
  0x55   : > { %1849 = vmatpush3.bf16.msra.mxu1 %v1987_v0  ;;  %1830 = vmatprep.subr.bf16.mxu0 %v1988_v1 }
  0x56   : > { %1850 = vmatprep.subr.bf16.mxu1 %v1989_v2 }
  0x58   : > { %1831 = vmatpush3.bf16.msra.mxu0 %v1988_v1 }
  0x59   : > { %1851 = vmatpush3.bf16.msra.mxu1 %v1989_v2  ;;  %1832 = vmatprep.subr.bf16.mxu0 %v1990_v3 }
  0x5a   : > { %1852 = vmatprep.subr.bf16.mxu1 %v1991_v4 }
  0x5c   : > { %1833 = vmatpush3.bf16.msra.mxu0 %v1990_v3 }
  0x5d   : > { %1853 = vmatpush3.bf16.msra.mxu1 %v1991_v4  ;;  %1834 = vmatprep.subr.bf16.mxu0 %v1992_v5 }
  0x5e   : > { %1854 = vmatprep.subr.bf16.mxu1 %v1993_v6 }
  0x60   : > { %1835 = vmatpush3.bf16.msra.mxu0 %v1992_v5 }
  0x61   : > { %1855 = vmatpush3.bf16.msra.mxu1 %v1993_v6  ;;  %1836 = vmatprep.subr.bf16.mxu0 %v1994_v7 }
  0x62   : > { %1856 = vmatprep.subr.bf16.mxu1 %v1995_v8 }
  0x64   : > { %1837 = vmatpush3.bf16.msra.mxu0 %v1994_v7 }
  0x65   : > { %1857 = vmatpush3.bf16.msra.mxu1 %v1995_v8  ;;  %1862 = vmatprep.subr.bf16.mxu0 %v1996_v10 }
  0x66   : > { %1882 = vmatprep.subr.bf16.mxu1 %v1997_v12 }
  0x67   : > { %1839 = vmatmul.mubr.bf16.vlgmr.msra.gmra.mrb[8].mxu0 %v686_v13 }
  0x68   : > { %1863 = vmatpush3.bf16.msra.mxu0 %v1996_v10  ;;  %1859 = vmatmul.mubr.bf16.vlgmr.msra.gmra.mrb[8].mxu1 %v809_v16 }
  0x69   : > { %1883 = vmatpush3.bf16.msra.mxu1 %v1997_v12  ;;  %1864 = vmatprep.subr.bf16.mxu0 %v1998_v19 }
  0x6a   : > { %1884 = vmatprep.subr.bf16.mxu1 %v1999_v20  ;;  %1878 = vmatprep.mubr.bf16.mxu0 %v931_v21 }
  0x6b   : > { %1898 = vmatprep.mubr.bf16.mxu1 %v1054_v22 }
  0x6c   : > { %1865 = vmatpush3.bf16.msra.mxu0 %v1998_v19 }
  0x6d   : > { %1885 = vmatpush3.bf16.msra.mxu1 %v1999_v20  ;;  %1866 = vmatprep.subr.bf16.mxu0 %v2000_v23 }
  0x6e   : > { %1886 = vmatprep.subr.bf16.mxu1 %v2001_v24 }
  0x70   : > { %1867 = vmatpush3.bf16.msra.mxu0 %v2000_v23 }
  0x71   : > { %1887 = vmatpush3.bf16.msra.mxu1 %v2001_v24  ;;  %1868 = vmatprep.subr.bf16.mxu0 %v2002_v25 }
  0x72   : > { %1888 = vmatprep.subr.bf16.mxu1 %v2003_v26 }
  0x74   : > { %1869 = vmatpush3.bf16.msra.mxu0 %v2002_v25 }
  0x75   : > { %1889 = vmatpush3.bf16.msra.mxu1 %v2003_v26  ;;  %1870 = vmatprep.subr.bf16.mxu0 %v2004_v27 }
  0x76   : > { %1890 = vmatprep.subr.bf16.mxu1 %v2005_v28 }
  0x78   : > { %1871 = vmatpush3.bf16.msra.mxu0 %v2004_v27 }
  0x79   : > { %1891 = vmatpush3.bf16.msra.mxu1 %v2005_v28  ;;  %1872 = vmatprep.subr.bf16.mxu0 %v2006_v29 }
  0x7a   : > { %1892 = vmatprep.subr.bf16.mxu1 %v2007_v30 }
  0x7c   : > { %1873 = vmatpush3.bf16.msra.mxu0 %v2006_v29 }
  0x7d   : > { %1893 = vmatpush3.bf16.msra.mxu1 %v2007_v30  ;;  %1874 = vmatprep.subr.bf16.mxu0 %v2008_v31 }
  0x7e   : > { %1894 = vmatprep.subr.bf16.mxu1 %v2009_v32 }
  0x80   : > { %1875 = vmatpush3.bf16.msra.mxu0 %v2008_v31 }
  0x81   : > { %1895 = vmatpush3.bf16.msra.mxu1 %v2009_v32  ;;  %1876 = vmatprep.subr.bf16.mxu0 %v2010_v33 }
  0x82   : > { %1896 = vmatprep.subr.bf16.mxu1 %v2011_v34 }
  0x84   : > { %1877 = vmatpush3.bf16.msra.mxu0 %v2010_v33 }
  0x85   : > { %1897 = vmatpush3.bf16.msra.mxu1 %v2011_v34  ;;  %1902 = vmatprep.subr.bf16.mxu0 %v2012_v38 }
  0x87   : > { %1879 = vmatmul.mubr.bf16.vlgmr.msra.gmra.mrb[12].mxu0 %v932_v41 }
  0x88   : > { %1903 = vmatpush3.bf16.msra.mxu0 %v2012_v38  ;;  %1899 = vmatmul.mubr.bf16.vlgmr.msra.gmra.mrb[12].mxu1 %v1055_v42  ;;  %v1649_v42 = vld [vmem:[%s2368_s2] ss:$0 sm:$0xff] }
  0x89   : > { %1904 = vmatprep.subr.bf16.mxu0 %v2013_v43  ;;  %1918 = vmatprep.mubr.bf16.mxu0 %v1177_v39  ;;  %v2019_v39 = vld [vmem:[%s2367_s1 + $0x238] sm:$0xff]  }
  0x8c   : > { %1905 = vmatpush3.bf16.msra.mxu0 %v2013_v43 }
  0x8d   : > { %1906 = vmatprep.subr.bf16.mxu0 %v2014_v44 }
  0x90   : > { %1907 = vmatpush3.bf16.msra.mxu0 %v2014_v44 }
  0x91   : > { %1908 = vmatprep.subr.bf16.mxu0 %v2015_v45 }
  0x94   : > { %1909 = vmatpush3.bf16.msra.mxu0 %v2015_v45 }
  0x95   : > { %1910 = vmatprep.subr.bf16.mxu0 %v2016_v46 }
  0x98   : > { %1911 = vmatpush3.bf16.msra.mxu0 %v2016_v46 }
  0x99   : > { %1912 = vmatprep.subr.bf16.mxu0 %v2017_v35 }
  0x9c   : > { %1913 = vmatpush3.bf16.msra.mxu0 %v2017_v35 }
  0x9d   : > { %1914 = vmatprep.subr.bf16.mxu0 %v2018_v36 }
  0xa0   : > { %1915 = vmatpush3.bf16.msra.mxu0 %v2018_v36 }
  0xa1   : > { %1916 = vmatprep.subr.bf16.mxu0 %v2019_v39 }
  0xa4   : > { %1917 = vmatpush3.bf16.msra.mxu0 %v2019_v39 }
  0xa7   : > { %1919 = vmatmul.mubr.bf16.vlgmr.msra.gmra.mrb[16].mxu0 %v1178_v48 }
  0xfa   : > { %v1760_v49 = vpop.f32.mrb[0].mxu0 }
  0xfb   : > { %v1780_v50 = vpop.f32.mrb[0].mxu1  ;;  %v324_v51 = vpop.f32.mrb[1].mxu0 }
  0xfc   : > { %v429_v52 = vadd.f32 %v1780_v50, %v1760_v49  ;;  %v420_v53 = vpop.f32.mrb[1].mxu1  ;;  %v1761_v54 = vpop.f32.mrb[2].mxu0 }
  0xfd   : > { %v421_v55 = vadd.f32 %v420_v53, %v324_v51  ;;  %v1781_v56 = vpop.f32.mrb[2].mxu1  ;;  %v327_v57 = vpop.f32.mrb[3].mxu0 }
  0xfe   : > { %v423_v58 = vpop.f32.mrb[3].mxu1 }
  0xff   : > { %v424_v59 = vadd.f32 %v423_v58, %v327_v57 }
 0x11a   : > { %v1800_v60 = vpop.f32.mrb[4].mxu0 }
 0x11b   : > { %v556_v61 = vadd.f32 %v1800_v60, %v429_v52  ;;  %v540_v62 = vpop.f32.mrb[5].mxu0  ;;  %v1820_v63 = vpop.f32.mrb[4].mxu1 }
 0x11c   : > { %v554_v0 = vadd.f32 %v540_v62, %v421_v55  ;;  %v1801_v1 = vpop.f32.mrb[6].mxu0  ;;  %v663_v2 = vpop.f32.mrb[5].mxu1 }
 0x11d   : > { %v679_v3 = vadd.f32 %v1820_v63, %v556_v61  ;;  %v543_v4 = vpop.f32.mrb[7].mxu0  ;;  %v1821_v5 = vpop.f32.mrb[6].mxu1 }
 0x11e   : > { %v555_v6 = vadd.f32 %v543_v4, %v424_v59  ;;  %v677_v7 = vadd.f32 %v663_v2, %v554_v0  ;;  %v666_v8 = vpop.f32.mrb[7].mxu1 }
 0x120   : > { %v678_v9 = vadd.f32 %v666_v8, %v555_v6 }
 0x13a   : > { %v1840_v10 = vpop.f32.mrb[8].mxu0 }
 0x13b   : > { %v802_v11 = vadd.f32 %v1840_v10, %v679_v3  ;;  %v786_v12 = vpop.f32.mrb[9].mxu0  ;;  %v1860_v13 = vpop.f32.mrb[8].mxu1 }
 0x13c   : > { %v800_v14 = vadd.f32 %v786_v12, %v677_v7  ;;  %v1841_v15 = vpop.f32.mrb[10].mxu0  ;;  %v909_v16 = vpop.f32.mrb[9].mxu1 }
 0x13d   : > { %v925_v17 = vadd.f32 %v1860_v13, %v802_v11  ;;  %v789_v18 = vpop.f32.mrb[11].mxu0  ;;  %v1861_v19 = vpop.f32.mrb[10].mxu1 }
 0x13e   : > { %v801_v20 = vadd.f32 %v789_v18, %v678_v9  ;;  %v923_v21 = vadd.f32 %v909_v16, %v800_v14  ;;  %v912_v22 = vpop.f32.mrb[11].mxu1 }
 0x140   : > { %v924_v23 = vadd.f32 %v912_v22, %v801_v20 }
 0x15a   : > { %v1880_v24 = vpop.f32.mrb[12].mxu0 }
 0x15b   : > { %v1048_v25 = vadd.f32 %v1880_v24, %v925_v17  ;;  %v1032_v26 = vpop.f32.mrb[13].mxu0  ;;  %v1900_v27 = vpop.f32.mrb[12].mxu1 }
 0x15c   : > { %v1046_v28 = vadd.f32 %v1032_v26, %v923_v21  ;;  %v1881_v29 = vpop.f32.mrb[14].mxu0  ;;  %v1155_v30 = vpop.f32.mrb[13].mxu1 }
 0x15d   : > { %v1171_v31 = vadd.f32 %v1900_v27, %v1048_v25  ;;  %v1035_v32 = vpop.f32.mrb[15].mxu0  ;;  %v1901_v33 = vpop.f32.mrb[14].mxu1 }
 0x15e   : > { %v1047_v34 = vadd.f32 %v1035_v32, %v924_v23  ;;  %v1169_v37 = vadd.f32 %v1155_v30, %v1046_v28  ;;  %v1158_v38 = vpop.f32.mrb[15].mxu1 }
 0x160   : > { %v1170_v40 = vadd.f32 %v1158_v38, %v1047_v34 }
 0x17a   : > { %v1920_v41 = vpop.f32.mrb[16].mxu0 }
 0x17b   : > { %v1294_v43 = vadd.f32 %v1920_v41, %v1171_v31  ;;  %v1278_v44 = vpop.f32.mrb[17].mxu0 }
 0x17c   : > { %v1292_v45 = vadd.f32 %v1278_v44, %v1169_v37  ;;  %v1921_v46 = vpop.f32.mrb[18].mxu0 }
 0x17d   : > { %v1304_v35 = vadd.f32 %v1649_v42, %v1294_v43  ;;  %v1281_v36 = vpop.f32.mrb[19].mxu0 }
 0x17e   : > { %v1302_v39 = vadd.f32 %v1649_v42, %v1292_v45  ;;  %v1293_v47 = vadd.f32 %v1281_v36, %v1170_v40 }
 0x17f   : > { %v1307_v48 = vmax.f32 %v1304_v35, 0.0 }
 0x180   : > { %v1305_v49 = vmax.f32 %v1302_v39, 0.0  ;;  %v1303_v50 = vadd.f32 %v1649_v42, %v1293_v47 }
 0x181   : > { %1310 = vst [vmem:[%s192_s8 + $0x10] sm:$0xff] %v1307_v48 }
 0x182   : > { %1308 = vst [vmem:[%s192_s8] sm:$0xff] %v1305_v49  ;;  %v1306_v51 = vmax.f32 %v1303_v50, 0.0 }
 0x184   : > { %1309 = vst [vmem:[%s192_s8 + $0x8] sm:$0xff] %v1306_v51 }
 0x185 PF: > { %s13_s14 = sadd.s32 1, %s2042_s14   ;;  %s2370_s12 = smov %s2038_s13 }
 0x186   : > { %p10_p5 = scmp.ge.s32.totalorder %s13_s14, 4   ;;  %s2371_s13 = smov %s2373_s15 }
 0x188   :  { %12 = sbr.rel (!%p10_p5) target bundleno = 2 (0x2), region = 79 }

</bundles_post_ra>
